<compile_context>
chip_gen: v5e
topology: v5e:2x2
jax: 0.10.0
libtpu: 0.0.40
codegen_flags: <defaults>
</compile_context>

<pallas_src>
import numpy as np
import jax
import jax.numpy as jnp
from jax.experimental import pallas as pl
from jax.experimental.pallas import tpu as pltpu

# ---- scaled-down config, structurally identical to NetKnowledge ------------
B = 2                      # batch
SEQ = 48                   # sequence_len
EMB = 32                   # embedding_len
C1, C2, C3 = 64, 32, 16    # channel_num1..3
K1, K2, K3 = 3, 4, 5       # kernel_size1..3
POOL = 3                   # pool1
OUT = 64                   # output_len (knowledge_n)
VOCAB = 50

P1, P2, P3 = K1 - 1, K2 - 1, K3 - 1
LPAD1 = SEQ + 2 * P1                 # padded input length for conv1 (52)
L1 = LPAD1 - K1 + 1                  # conv1 out length (50)
LP = L1 // POOL                      # after max_pool1d(3)   (16)
LPAD2 = LP + 2 * P2                  # padded conv2 input    (22)
L2 = LPAD2 - K2 + 1                  # conv2 out length      (19)
LPAD3 = L2 + 2 * P3                  # padded conv3 input    (27)
L3 = LPAD3 - K3 + 1                  # conv3 out length      (23)
FULL_IN = (SEQ + K1 - 1) // POOL + K2 + K3 - 2
assert L3 == FULL_IN
TPOOL = LP * POOL                    # conv1 rows consumed by the pool (48)

# Per-batch sublane block for batch stacking: multiple of 8, >= L1.
R = 56
BR = B * R                           # stacked rows (112)
NT = BR - (POOL - 1)                 # rows of sliding-max array (110)
NR2 = BR - (K2 - 1)                  # rows of conv2 output      (109)
NR3 = BR - (K3 - 1)                  # rows of conv3 output      (108)


def net_knowledge_kernel(cols1_ref, sel1_ref, pad3_ref,
                         w1_ref, b1_ref, w2_ref, b2_ref, w3_ref, b3_ref,
                         wf_ref, bf_ref, out_ref):
    f32, bf16 = jnp.float32, jnp.bfloat16

    # ---- conv1: ONE batch-stacked im2col matmul (im2col built in wrapper) ---
    h1 = jnp.maximum(
        jnp.dot(cols1_ref[...], w1_ref[...], preferred_element_type=f32)
        + b1_ref[...], 0.0)                                    # (BR, C1) f32

    # ---- max_pool1d(3): sliding max of 3 shifted slices, then the stride-3
    #      down-select fused with conv2's zero padding via one block-diagonal
    #      0/1 bf16 matmul (exact). ------------------------------------------
    t = jnp.maximum(jnp.maximum(h1[0:NT, :], h1[1:NT + 1, :]),
                    h1[2:NT + 2, :]).astype(bf16)              # (NT, C1)
    hp = jnp.dot(sel1_ref[...], t,
                 preferred_element_type=f32).astype(bf16)      # (BR, C1)

    # ---- conv2: bf16 slices -> one im2col matmul ----------------------------
    cols2 = jnp.concatenate([hp[j:j + NR2, :] for j in range(K2)], axis=1)
    h2 = jnp.maximum(
        jnp.dot(cols2, w2_ref[...], preferred_element_type=f32)
        + b2_ref[...], 0.0)                                    # (NR2, C2) f32

    # ---- conv3 zero-pad via block-diagonal 0/1 bf16 matmul, then conv3 ------
    h2p = jnp.dot(pad3_ref[...], h2.astype(bf16),
                  preferred_element_type=f32).astype(bf16)     # (BR, C2)
    cols3 = jnp.concatenate([h2p[j:j + NR3, :] for j in range(K3)], axis=1)
    h3 = jnp.maximum(
        jnp.dot(cols3, w3_ref[...], preferred_element_type=f32)
        + b3_ref[...], 0.0)                                    # (NR3, C3) f32

    # ---- F.max_pool1d over conv3 channels (model transposes first) ----------
    m = jnp.max(h3, axis=1, keepdims=True)                     # (NR3, 1) f32

    # ---- Linear(FULL_IN -> OUT): per-batch aligned slice (offset b*R is a
    #      multiple of 8), f32 broadcast-mul + sublane reduce, single store ---
    wf = wf_ref[...]                                           # (L3, OUT) f32
    rows = [jnp.sum(m[b * R:b * R + L3, :] * wf, axis=0, keepdims=True)
            for b in range(B)]
    out_ref[...] = jnp.concatenate(rows, axis=0) + bf_ref[...]


def net_knowledge_forward(x_emb, w1, b1, w2, b2, w3, b3, wf, bf):
    bf16 = jnp.bfloat16

    # ---- one-time layout prep in the wrapper (XLA side) ---------------------
    # conv1 zero padding + im2col, batch-stacked into R-row blocks, bf16.
    x_pad = jnp.pad(x_emb, ((0, 0), (P1, P1), (0, 0)))          # (B, LPAD1, EMB)
    cols1 = jnp.concatenate([x_pad[:, j:j + L1, :] for j in range(K1)],
                            axis=2)                             # (B, L1, K1*EMB)
    cols1 = jnp.pad(cols1, ((0, 0), (0, R - L1), (0, 0)))       # (B, R, K1*EMB)
    cols1 = cols1.reshape(BR, K1 * EMB).astype(bf16)

    # Block-diagonal 0/1 selection matrices (bf16 constants).
    rk = np.arange(BR)[:, None]
    blk, k_in = rk // R, rk % R
    # sel1: row b*R+k picks t[b*R + 3*(k-P2)] for k in [P2, P2+LP); all other
    # rows are zero, i.e. they ARE conv2's zero padding.
    cj = np.arange(NT)[None, :]
    sel1 = ((k_in >= P2) & (k_in < P2 + LP)
            & (cj == blk * R + POOL * (k_in - P2))).astype(np.float32)
    # pad3: row b*R+k picks h2[b*R + (k-P3)] for k in [P3, P3+L2); zero pad.
    cj3 = np.arange(NR2)[None, :]
    pad3 = ((k_in >= P3) & (k_in < P3 + L2)
            & (cj3 == blk * R + (k_in - P3))).astype(np.float32)
    sel1 = jnp.asarray(sel1, bf16)
    pad3 = jnp.asarray(pad3, bf16)

    # im2col-ready conv weights, bf16 (f32 MXU accumulation in-kernel).
    w1m = w1.reshape(K1 * EMB, C1).astype(bf16)
    w2m = w2.reshape(K2 * C1, C2).astype(bf16)
    w3m = w3.reshape(K3 * C2, C3).astype(bf16)

    # TODO(synk): at the real NetKnowledge config (B=32, SEQ=600, channels
    # 400/200/100, OUT=497) the batch should be tiled over a parallel grid
    # (one or a few samples per grid step; dual-TC split on v7x) instead of a
    # single stacked block, and VMEM tiling re-derived.
    return pl.pallas_call(
        net_knowledge_kernel,
        out_shape=jax.ShapeDtypeStruct((B, OUT), jnp.float32),
        grid=(1,),   # whole (stacked) batch in one kernel invocation
        in_specs=[
            pl.BlockSpec((BR, K1 * EMB), lambda i: (0, 0)),     # stacked im2col x
            pl.BlockSpec((BR, NT), lambda i: (0, 0)),           # pool/pad select
            pl.BlockSpec((BR, NR2), lambda i: (0, 0)),          # conv3 pad select
            pl.BlockSpec((K1 * EMB, C1), lambda i: (0, 0)),     # conv1 weight
            pl.BlockSpec((1, C1), lambda i: (0, 0)),            # conv1 bias
            pl.BlockSpec((K2 * C1, C2), lambda i: (0, 0)),      # conv2 weight
            pl.BlockSpec((1, C2), lambda i: (0, 0)),            # conv2 bias
            pl.BlockSpec((K3 * C2, C3), lambda i: (0, 0)),      # conv3 weight
            pl.BlockSpec((1, C3), lambda i: (0, 0)),            # conv3 bias
            pl.BlockSpec((FULL_IN, OUT), lambda i: (0, 0)),     # linear weight
            pl.BlockSpec((1, OUT), lambda i: (0, 0)),           # linear bias
        ],
        out_specs=pl.BlockSpec((B, OUT), lambda i: (0, 0)),
        compiler_params=pltpu.CompilerParams(
            dimension_semantics=("arbitrary",)),
    )(cols1, sel1, pad3, w1m, b1, w2m, b2, w3m, b3, wf, bf)


# ---- pure-JAX reference mirroring the PyTorch forward (NCL conv, f32) -------
def reference(tokens, emb_table, w1, b1, w2, b2, w3, b3, wf, bf):
    x = emb_table[tokens]                       # (B, SEQ, EMB)  nn.Embedding
    x = jnp.transpose(x, (0, 2, 1))             # (B, EMB, SEQ)  transpose(1, 2)

    def conv1d(x, w_kio, b, pad):
        w_oik = jnp.transpose(w_kio, (2, 1, 0))  # PyTorch (C_out, C_in, k)
        y = jax.lax.conv_general_dilated(
            x, w_oik, window_strides=(1,), padding=[(pad, pad)],
            dimension_numbers=("NCH", "OIH", "NCH"))
        return y + b[0][None, :, None]

    h = jax.nn.relu(conv1d(x, w1, b1, P1))                        # (B, C1, L1)
    h = jnp.max(h[..., :LP * POOL].reshape(B, C1, LP, POOL), -1)  # max_pool1d(3)
    h = jax.nn.relu(conv1d(h, w2, b2, P2))                        # (B, C2, L2)
    h = jax.nn.relu(conv1d(h, w3, b3, P3))                        # (B, C3, L3)
    m = jnp.max(h, axis=1)                                        # channel max
    return m @ wf + bf                                            # Linear


if __name__ == "__main__":
    key = jax.random.PRNGKey(0)
    ks = jax.random.split(key, 10)

    emb_table = jax.random.normal(ks[0], (VOCAB, EMB), jnp.float32) * 0.5
    emb_table = emb_table.at[0].set(0.0)          # padding_idx=0
    tokens = jax.random.randint(ks[1], (B, SEQ), 0, VOCAB)

    def conv_w(k, kk, cin, cout):
        return jax.random.normal(k, (kk, cin, cout), jnp.float32) / np.sqrt(cin * kk)

    w1 = conv_w(ks[2], K1, EMB, C1)
    b1 = jax.random.normal(ks[3], (1, C1), jnp.float32) * 0.1
    w2 = conv_w(ks[4], K2, C1, C2)
    b2 = jax.random.normal(ks[5], (1, C2), jnp.float32) * 0.1
    w3 = conv_w(ks[6], K3, C2, C3)
    b3 = jax.random.normal(ks[7], (1, C3), jnp.float32) * 0.1
    wf = jax.random.normal(ks[8], (FULL_IN, OUT), jnp.float32) / np.sqrt(FULL_IN)
    bf = jax.random.normal(ks[9], (1, OUT), jnp.float32) * 0.1

    # TODO(synk): nn.Embedding lookup (data-dependent HBM gather) stays in
    # plain JAX outside the kernel; conv1 zero padding + im2col are one-time
    # layout prep done wrapper-side (XLA) per the perf review.
    x_emb = emb_table[tokens]                                     # (B, SEQ, EMB)

    out = net_knowledge_forward(x_emb, w1, b1, w2, b2, w3, b3, wf, bf)
    out = jax.block_until_ready(out)

    ref = reference(tokens, emb_table, w1, b1, w2, b2, w3, b3, wf, bf)
    # bf16 matmul operands (f32 accumulation) vs. the f32 reference.
    np.testing.assert_allclose(np.asarray(out), np.asarray(ref),
                               rtol=2e-2, atol=2e-2)
    print("KERNEL_OK")
</pallas_src>

<mosaic_0001>
module attributes {stable_mosaic.version = 11 : i64} {
  func.func @net_knowledge_kernel(%arg0: i32, %arg1: memref<112x96xbf16, #tpu.memory_space<vmem>>, %arg2: memref<112x110xbf16, #tpu.memory_space<vmem>>, %arg3: memref<112x109xbf16, #tpu.memory_space<vmem>>, %arg4: memref<96x64xbf16, #tpu.memory_space<vmem>>, %arg5: memref<1x64xf32, #tpu.memory_space<vmem>>, %arg6: memref<256x32xbf16, #tpu.memory_space<vmem>>, %arg7: memref<1x32xf32, #tpu.memory_space<vmem>>, %arg8: memref<160x16xbf16, #tpu.memory_space<vmem>>, %arg9: memref<1x16xf32, #tpu.memory_space<vmem>>, %arg10: memref<23x64xf32, #tpu.memory_space<vmem>>, %arg11: memref<1x64xf32, #tpu.memory_space<vmem>>, %arg12: memref<2x64xf32, #tpu.memory_space<vmem>>) attributes {dimension_semantics = [#tpu.dimension_semantics<arbitrary>], iteration_bounds = array<i64: 1>, scalar_prefetch = 0 : i64, scratch_operands = 0 : i64, tpu.core_type = #tpu.core_type<tc>, window_params = [{pipeline_mode = #tpu.pipeline_mode<synchronous>, transform_indices = @transform_0, window_bounds = array<i64: 112, 96>}, {pipeline_mode = #tpu.pipeline_mode<synchronous>, transform_indices = @transform_1, window_bounds = array<i64: 112, 110>}, {pipeline_mode = #tpu.pipeline_mode<synchronous>, transform_indices = @transform_2, window_bounds = array<i64: 112, 109>}, {pipeline_mode = #tpu.pipeline_mode<synchronous>, transform_indices = @transform_3, window_bounds = array<i64: 96, 64>}, {pipeline_mode = #tpu.pipeline_mode<synchronous>, transform_indices = @transform_4, window_bounds = array<i64: 1, 64>}, {pipeline_mode = #tpu.pipeline_mode<synchronous>, transform_indices = @transform_5, window_bounds = array<i64: 256, 32>}, {pipeline_mode = #tpu.pipeline_mode<synchronous>, transform_indices = @transform_6, window_bounds = array<i64: 1, 32>}, {pipeline_mode = #tpu.pipeline_mode<synchronous>, transform_indices = @transform_7, window_bounds = array<i64: 160, 16>}, {pipeline_mode = #tpu.pipeline_mode<synchronous>, transform_indices = @transform_8, window_bounds = array<i64: 1, 16>}, {pipeline_mode = #tpu.pipeline_mode<synchronous>, transform_indices = @transform_9, window_bounds = array<i64: 23, 64>}, {pipeline_mode = #tpu.pipeline_mode<synchronous>, transform_indices = @transform_10, window_bounds = array<i64: 1, 64>}, {pipeline_mode = #tpu.pipeline_mode<synchronous>, transform_indices = @transform_11, window_bounds = array<i64: 2, 64>}]} {
    %c0 = arith.constant 0 : index
    %c0_0 = arith.constant 0 : index
    %0 = vector.load %arg1[%c0, %c0_0] : memref<112x96xbf16, #tpu.memory_space<vmem>>, vector<112x96xbf16>
    %c0_1 = arith.constant 0 : index
    %c0_2 = arith.constant 0 : index
    %1 = vector.load %arg4[%c0_1, %c0_2] : memref<96x64xbf16, #tpu.memory_space<vmem>>, vector<96x64xbf16>
    %cst = arith.constant dense<0.000000e+00> : vector<112x64xf32>
    %2 = tpu.matmul %0, %1, %cst {dimension_numbers = #tpu.dot_dimension_numbers<[1], [0], [0], [1], [0, 0, 1, 1], [], []>} : vector<112x96xbf16>, vector<96x64xbf16>, vector<112x64xf32> -> vector<112x64xf32>
    %c0_3 = arith.constant 0 : index
    %c0_4 = arith.constant 0 : index
    %3 = vector.load %arg5[%c0_3, %c0_4] : memref<1x64xf32, #tpu.memory_space<vmem>>, vector<1x64xf32>
    %4 = vector.broadcast %3 : vector<1x64xf32> to vector<112x64xf32>
    %5 = arith.addf %2, %4 : vector<112x64xf32>
    %cst_5 = arith.constant 0.000000e+00 : f32
    %6 = vector.broadcast %cst_5 : f32 to vector<112x64xf32>
    %7 = arith.maximumf %5, %6 : vector<112x64xf32>
    %8 = vector.extract_strided_slice %7 {offsets = [0, 0], sizes = [110, 64], strides = [1, 1]} : vector<112x64xf32> to vector<110x64xf32>
    %9 = vector.extract_strided_slice %7 {offsets = [1, 0], sizes = [110, 64], strides = [1, 1]} : vector<112x64xf32> to vector<110x64xf32>
    %10 = arith.maximumf %8, %9 : vector<110x64xf32>
    %11 = vector.extract_strided_slice %7 {offsets = [2, 0], sizes = [110, 64], strides = [1, 1]} : vector<112x64xf32> to vector<110x64xf32>
    %12 = arith.maximumf %10, %11 : vector<110x64xf32>
    %13 = arith.truncf %12 : vector<110x64xf32> to vector<110x64xbf16>
    %c0_6 = arith.constant 0 : index
    %c0_7 = arith.constant 0 : index
    %14 = vector.load %arg2[%c0_6, %c0_7] : memref<112x110xbf16, #tpu.memory_space<vmem>>, vector<112x110xbf16>
    %cst_8 = arith.constant dense<0.000000e+00> : vector<112x64xf32>
    %15 = tpu.matmul %14, %13, %cst_8 {dimension_numbers = #tpu.dot_dimension_numbers<[1], [0], [0], [1], [0, 0, 1, 1], [], []>} : vector<112x110xbf16>, vector<110x64xbf16>, vector<112x64xf32> -> vector<112x64xf32>
    %16 = arith.truncf %15 : vector<112x64xf32> to vector<112x64xbf16>
    %17 = vector.extract_strided_slice %16 {offsets = [0, 0], sizes = [109, 64], strides = [1, 1]} : vector<112x64xbf16> to vector<109x64xbf16>
    %18 = vector.extract_strided_slice %16 {offsets = [1, 0], sizes = [109, 64], strides = [1, 1]} : vector<112x64xbf16> to vector<109x64xbf16>
    %19 = vector.extract_strided_slice %16 {offsets = [2, 0], sizes = [109, 64], strides = [1, 1]} : vector<112x64xbf16> to vector<109x64xbf16>
    %20 = vector.extract_strided_slice %16 {offsets = [3, 0], sizes = [109, 64], strides = [1, 1]} : vector<112x64xbf16> to vector<109x64xbf16>
    %21 = tpu.concatenate %17, %18, %19, %20 in 1 : vector<109x64xbf16>, vector<109x64xbf16>, vector<109x64xbf16>, vector<109x64xbf16> -> vector<109x256xbf16>
    %c0_9 = arith.constant 0 : index
    %c0_10 = arith.constant 0 : index
    %22 = vector.load %arg6[%c0_9, %c0_10] : memref<256x32xbf16, #tpu.memory_space<vmem>>, vector<256x32xbf16>
    %cst_11 = arith.constant dense<0.000000e+00> : vector<109x32xf32>
    %23 = tpu.matmul %21, %22, %cst_11 {dimension_numbers = #tpu.dot_dimension_numbers<[1], [0], [0], [1], [0, 0, 1, 1], [], []>} : vector<109x256xbf16>, vector<256x32xbf16>, vector<109x32xf32> -> vector<109x32xf32>
    %c0_12 = arith.constant 0 : index
    %c0_13 = arith.constant 0 : index
    %24 = vector.load %arg7[%c0_12, %c0_13] : memref<1x32xf32, #tpu.memory_space<vmem>>, vector<1x32xf32>
    %25 = vector.broadcast %24 : vector<1x32xf32> to vector<109x32xf32>
    %26 = arith.addf %23, %25 : vector<109x32xf32>
    %cst_14 = arith.constant 0.000000e+00 : f32
    %27 = vector.broadcast %cst_14 : f32 to vector<109x32xf32>
    %28 = arith.maximumf %26, %27 : vector<109x32xf32>
    %c0_15 = arith.constant 0 : index
    %c0_16 = arith.constant 0 : index
    %29 = vector.load %arg3[%c0_15, %c0_16] : memref<112x109xbf16, #tpu.memory_space<vmem>>, vector<112x109xbf16>
    %30 = arith.truncf %28 : vector<109x32xf32> to vector<109x32xbf16>
    %cst_17 = arith.constant dense<0.000000e+00> : vector<112x32xf32>
    %31 = tpu.matmul %29, %30, %cst_17 {dimension_numbers = #tpu.dot_dimension_numbers<[1], [0], [0], [1], [0, 0, 1, 1], [], []>} : vector<112x109xbf16>, vector<109x32xbf16>, vector<112x32xf32> -> vector<112x32xf32>
    %32 = arith.truncf %31 : vector<112x32xf32> to vector<112x32xbf16>
    %33 = vector.extract_strided_slice %32 {offsets = [0, 0], sizes = [108, 32], strides = [1, 1]} : vector<112x32xbf16> to vector<108x32xbf16>
    %34 = vector.extract_strided_slice %32 {offsets = [1, 0], sizes = [108, 32], strides = [1, 1]} : vector<112x32xbf16> to vector<108x32xbf16>
    %35 = vector.extract_strided_slice %32 {offsets = [2, 0], sizes = [108, 32], strides = [1, 1]} : vector<112x32xbf16> to vector<108x32xbf16>
    %36 = vector.extract_strided_slice %32 {offsets = [3, 0], sizes = [108, 32], strides = [1, 1]} : vector<112x32xbf16> to vector<108x32xbf16>
    %37 = vector.extract_strided_slice %32 {offsets = [4, 0], sizes = [108, 32], strides = [1, 1]} : vector<112x32xbf16> to vector<108x32xbf16>
    %38 = tpu.concatenate %33, %34, %35, %36, %37 in 1 : vector<108x32xbf16>, vector<108x32xbf16>, vector<108x32xbf16>, vector<108x32xbf16>, vector<108x32xbf16> -> vector<108x160xbf16>
    %c0_18 = arith.constant 0 : index
    %c0_19 = arith.constant 0 : index
    %39 = vector.load %arg8[%c0_18, %c0_19] : memref<160x16xbf16, #tpu.memory_space<vmem>>, vector<160x16xbf16>
    %cst_20 = arith.constant dense<0.000000e+00> : vector<108x16xf32>
    %40 = tpu.matmul %38, %39, %cst_20 {dimension_numbers = #tpu.dot_dimension_numbers<[1], [0], [0], [1], [0, 0, 1, 1], [], []>} : vector<108x160xbf16>, vector<160x16xbf16>, vector<108x16xf32> -> vector<108x16xf32>
    %c0_21 = arith.constant 0 : index
    %c0_22 = arith.constant 0 : index
    %41 = vector.load %arg9[%c0_21, %c0_22] : memref<1x16xf32, #tpu.memory_space<vmem>>, vector<1x16xf32>
    %42 = vector.broadcast %41 : vector<1x16xf32> to vector<108x16xf32>
    %43 = arith.addf %40, %42 : vector<108x16xf32>
    %cst_23 = arith.constant 0.000000e+00 : f32
    %44 = vector.broadcast %cst_23 : f32 to vector<108x16xf32>
    %45 = arith.maximumf %43, %44 : vector<108x16xf32>
    %cst_24 = arith.constant dense<0xFF800000> : vector<108xf32>
    %46 = vector.multi_reduction <maximumf>, %45, %cst_24 [1] : vector<108x16xf32> to vector<108xf32>
    %47 = vector.shape_cast %46 : vector<108xf32> to vector<108x1xf32>
    %c0_25 = arith.constant 0 : index
    %c0_26 = arith.constant 0 : index
    %48 = vector.load %arg10[%c0_25, %c0_26] : memref<23x64xf32, #tpu.memory_space<vmem>>, vector<23x64xf32>
    %49 = vector.extract_strided_slice %47 {offsets = [0, 0], sizes = [23, 1], strides = [1, 1]} : vector<108x1xf32> to vector<23x1xf32>
    %50 = vector.broadcast %49 : vector<23x1xf32> to vector<23x64xf32>
    %51 = arith.mulf %50, %48 : vector<23x64xf32>
    %cst_27 = arith.constant dense<0.000000e+00> : vector<64xf32>
    %52 = vector.multi_reduction <add>, %51, %cst_27 [0] : vector<23x64xf32> to vector<64xf32>
    %53 = vector.shape_cast %52 : vector<64xf32> to vector<1x64xf32>
    %54 = vector.extract_strided_slice %47 {offsets = [56, 0], sizes = [23, 1], strides = [1, 1]} : vector<108x1xf32> to vector<23x1xf32>
    %55 = vector.broadcast %54 : vector<23x1xf32> to vector<23x64xf32>
    %56 = arith.mulf %55, %48 : vector<23x64xf32>
    %cst_28 = arith.constant dense<0.000000e+00> : vector<64xf32>
    %57 = vector.multi_reduction <add>, %56, %cst_28 [0] : vector<23x64xf32> to vector<64xf32>
    %58 = vector.shape_cast %57 : vector<64xf32> to vector<1x64xf32>
    %59 = tpu.concatenate %53, %58 in 0 : vector<1x64xf32>, vector<1x64xf32> -> vector<2x64xf32>
    %c0_29 = arith.constant 0 : index
    %c0_30 = arith.constant 0 : index
    %60 = vector.load %arg11[%c0_29, %c0_30] : memref<1x64xf32, #tpu.memory_space<vmem>>, vector<1x64xf32>
    %61 = vector.broadcast %60 : vector<1x64xf32> to vector<2x64xf32>
    %62 = arith.addf %59, %61 : vector<2x64xf32>
    %c0_31 = arith.constant 0 : index
    %c0_32 = arith.constant 0 : index
    %63 = vector.load %arg12[%c0_31, %c0_32] : memref<2x64xf32, #tpu.memory_space<vmem>>, vector<2x64xf32>
    tpu.vector_store %arg12[%c0_31, %c0_32], %62 {strides = array<i32>} : memref<2x64xf32, #tpu.memory_space<vmem>>, vector<2x64xf32>,
    return
  }
  func.func @transform_0(%arg0: i32) -> (i32, i32) {
    %c0_i32 = arith.constant 0 : i32
    %c0_i32_0 = arith.constant 0 : i32
    %c0_i32_1 = arith.constant 0 : i32
    return %c0_i32, %c0_i32_0 : i32, i32
  }
  func.func @transform_1(%arg0: i32) -> (i32, i32) {
    %c0_i32 = arith.constant 0 : i32
    %c0_i32_0 = arith.constant 0 : i32
    %c0_i32_1 = arith.constant 0 : i32
    return %c0_i32, %c0_i32_0 : i32, i32
  }
  func.func @transform_2(%arg0: i32) -> (i32, i32) {
    %c0_i32 = arith.constant 0 : i32
    %c0_i32_0 = arith.constant 0 : i32
    %c0_i32_1 = arith.constant 0 : i32
    return %c0_i32, %c0_i32_0 : i32, i32
  }
  func.func @transform_3(%arg0: i32) -> (i32, i32) {
    %c0_i32 = arith.constant 0 : i32
    %c0_i32_0 = arith.constant 0 : i32
    %c0_i32_1 = arith.constant 0 : i32
    return %c0_i32, %c0_i32_0 : i32, i32
  }
  func.func @transform_4(%arg0: i32) -> (i32, i32) {
    %c0_i32 = arith.constant 0 : i32
    %c0_i32_0 = arith.constant 0 : i32
    %c0_i32_1 = arith.constant 0 : i32
    return %c0_i32, %c0_i32_0 : i32, i32
  }
  func.func @transform_5(%arg0: i32) -> (i32, i32) {
    %c0_i32 = arith.constant 0 : i32
    %c0_i32_0 = arith.constant 0 : i32
    %c0_i32_1 = arith.constant 0 : i32
    return %c0_i32, %c0_i32_0 : i32, i32
  }
  func.func @transform_6(%arg0: i32) -> (i32, i32) {
    %c0_i32 = arith.constant 0 : i32
    %c0_i32_0 = arith.constant 0 : i32
    %c0_i32_1 = arith.constant 0 : i32
    return %c0_i32, %c0_i32_0 : i32, i32
  }
  func.func @transform_7(%arg0: i32) -> (i32, i32) {
    %c0_i32 = arith.constant 0 : i32
    %c0_i32_0 = arith.constant 0 : i32
    %c0_i32_1 = arith.constant 0 : i32
    return %c0_i32, %c0_i32_0 : i32, i32
  }
  func.func @transform_8(%arg0: i32) -> (i32, i32) {
    %c0_i32 = arith.constant 0 : i32
    %c0_i32_0 = arith.constant 0 : i32
    %c0_i32_1 = arith.constant 0 : i32
    return %c0_i32, %c0_i32_0 : i32, i32
  }
  func.func @transform_9(%arg0: i32) -> (i32, i32) {
    %c0_i32 = arith.constant 0 : i32
    %c0_i32_0 = arith.constant 0 : i32
    %c0_i32_1 = arith.constant 0 : i32
    return %c0_i32, %c0_i32_0 : i32, i32
  }
  func.func @transform_10(%arg0: i32) -> (i32, i32) {
    %c0_i32 = arith.constant 0 : i32
    %c0_i32_0 = arith.constant 0 : i32
    %c0_i32_1 = arith.constant 0 : i32
    return %c0_i32, %c0_i32_0 : i32, i32
  }
  func.func @transform_11(%arg0: i32) -> (i32, i32) {
    %c0_i32 = arith.constant 0 : i32
    %c0_i32_0 = arith.constant 0 : i32
    %c0_i32_1 = arith.constant 0 : i32
    return %c0_i32, %c0_i32_0 : i32, i32
  }
}

</mosaic_0001>

<bundles_post_ra>
// kernel: tpu_custom_call.1
= control target key start
LH: loop header
LB: loop body
LE: loop exit
PB: predicated region body
PF: predicated region fallthrough
CT: control target
= control target key end

     0   :  { %s2481_s0 = inlined_call_operand.vmem [shape: bf16[112,96], index: 0, kind: input, shape index: {}]   ;;  %s2482_s1 = inlined_call_operand.vmem [shape: bf16[112,110], index: 1, kind: input, shape index: {}]   ;;  %s2483_s2 = inlined_call_operand.vmem [shape: bf16[112,109], index: 2, kind: input, shape index: {}]   ;;  %s2484_s3 = inlined_call_operand.vmem [shape: bf16[96,64], index: 3, kind: input, shape index: {}]   ;;  %s2485_s4 = inlined_call_operand.vmem [shape: f32[1,64], index: 4, kind: input, shape index: {}]   ;;  %s2486_s5 = inlined_call_operand.vmem [shape: bf16[256,32], index: 5, kind: input, shape index: {}]   ;;  %s2487_s6 = inlined_call_operand.vmem [shape: f32[1,32], index: 6, kind: input, shape index: {}]   ;;  %s2488_s7 = inlined_call_operand.vmem [shape: bf16[160,16], index: 7, kind: input, shape index: {}]   ;;  %s2489_s8 = inlined_call_operand.vmem [shape: f32[1,16], index: 8, kind: input, shape index: {}]   ;;  %s2490_s9 = inlined_call_operand.vmem [shape: f32[23,64], index: 9, kind: input, shape index: {}]   ;;  %s2491_s10 = inlined_call_operand.vmem [shape: f32[1,64], index: 10, kind: input, shape index: {}]   ;;  %s2492_s11 = inlined_call_operand.hbm [shape: f32[2,64], index: 11, kind: output, shape index: {}]  }
   0x1   :  { %v1819_v0 = vld [vmem:[%s2484_s3 + $0x28] sm:$0xff]  ;;  %v1818_v1 = vld [vmem:[%s2484_s3 + $0x20] sm:$0xff] }
   0x2   :  { %165 = vmatpush.bf16.msra.mxu0 %v1819_v0 }
   0x3   :  { %16 = vsyncpa [#allocation3], 0  ;;  %v1817_v2 = vld [vmem:[%s2484_s3 + $0x18] sm:$0xff]  ;;  %v1816_v3 = vld [vmem:[%s2484_s3 + $0x10] sm:$0xff]  ;;  %vm141_vm0 = vcmask 785408   ;;  %vm235_vm1 = vcmask 1046528  }
   0x4   :  { %v1815_v4 = vld [vmem:[%s2484_s3 + $0x8] sm:$0xff]  ;;  %v1814_v5 = vld [vmem:[%s2484_s3] sm:$0xff]  ;;  %v1809_v8 = vld [vmem:[%s2481_s0 + $0x10] sm:$0xff]  ;;  %vm291_vm2 = vcmask 1045504   ;;  %vm403_vm3 = vcmask 900096   ;;  %vm647_vm6 = vcmask 523264  }
   0x5   :  { %v1807_v6 = vld [vmem:[%s2481_s0] sm:$0xff]  ;;  %v1808_v7 = vld [vmem:[%s2481_s0 + $0x8] sm:$0xff]  ;;  %v1810_v9 = vld [vmem:[%s2481_s0 + $0x18] sm:$0xff]  ;;  %vm521_vm4 = vsmask.f32 7424  ;;  %vm987_vm7 = vcmask 891904  }
   0x6   :  { %166 = vmatpush.bf16.msra.mxu0 %v1818_v1  ;;  %v1811_v10 = vld [vmem:[%s2481_s0 + $0x20] sm:$0xff]  ;;  %v1812_v11 = vld [vmem:[%s2481_s0 + $0x28] sm:$0xff]  ;;  %v1813_v12 = vld [vmem:[%s2481_s0 + $0x30] sm:$0xff]  ;;  %vm605_vm5 = vsmask.f32 6400  ;;  %vm1258_vm8 = vcmask 261120  }
   0x7   :  { %v2024_v14 = vld [vmem:[%s2485_s4] ss:$0 sm:$0xff]  ;;  %s1913_s23 = smov 96   ;;  %vm1491_vm9 = vcmask 130048   ;;  %vm1519_vm10 = vcmask 522240   ;;  %vm1542_vm11 = vcmask 1040384  }
   0x8   :  { %s1914_s22 = smov [#allocation2]   ;;  %s1558_s0 = sshll.u32 %s2492_s11, 4  ;;  %vm1549_vm12 = vcmask 517120   ;;  %s1559_s0 = int_to_ptr.hbm [resolvable:$true] %s1558_s0 }
   0xa   :  { %167 = vmatpush.bf16.msra.mxu0 %v1817_v2 }
   0xe   :  { %168 = vmatpush.bf16.msra.mxu0 %v1816_v3 }
  0x12   :  { %169 = vmatpush.bf16.msra.mxu0 %v1815_v4 }
  0x16   :  { %170 = vmatpush.bf16.msra.mxu0 %v1814_v5 }
  0x19   :  { %1619 = vmatmul.msk.bf16.vlgmr.msra.gmra.mxu0 %vm141_vm0, %v1807_v6 }
  0x29   :  { %1620 = vmatmul.msk.bf16.gmra.mxu0 %vm141_vm0, %v1808_v7 }
  0x39   :  { %1621 = vmatmul.msk.bf16.gmra.mxu0 %vm141_vm0, %v1809_v8 }
  0x49   :  { %1622 = vmatmul.msk.bf16.gmra.mxu0 %vm141_vm0, %v1810_v9 }
  0x59   :  { %1623 = vmatmul.msk.bf16.gmra.mxu0 %vm141_vm0, %v1811_v10 }
  0x69   :  { %1624 = vmatmul.msk.bf16.gmra.mxu0 %vm141_vm0, %v1812_v11 }
  0x79   :  { %1625 = vmatmul.msk.bf16.gmra.mxu0 %vm141_vm0, %v1813_v12 }
  0x96   :  { %v172_v13 = vpop.f32.mrf.mxu0 }
  0x97   :  { %v173_v16 = vadd.f32 %v2024_v14, %v172_v13 }
  0x99   :  { %v207_v19 = vmax.f32 %v173_v16, 0.0 }
  0x9b   :  { %v236_v22 = vrot.slane %v207_v19, 1  ;;  %v292_v30 = vrot.slane %v207_v19, 2 }
  0x9e   :  { %v174_v15 = vpop.f32.mrf.mxu0 }
  0x9f   :  { %v175_v17 = vadd.f32 %v2024_v14, %v174_v15 }
  0xa1   :  { %v208_v18 = vmax.f32 %v175_v17, 0.0 }
  0xa3   :  { %v237_v20 = vrot.slane %v208_v18, 1  ;;  %v293_v26 = vrot.slane %v208_v18, 2 }
  0xa5   :  { %v238_v25 = vsel %vm235_vm1, %v236_v22, %v237_v20  ;;  %v294_v35 = vsel %vm291_vm2, %v292_v30, %v293_v26 }
  0xa6   :  { %v177_v21 = vpop.f32.mrf.mxu0  ;;  %v277_v29 = vmax.f32 %v207_v19, %v238_v25 }
  0xa7   :  { %v178_v23 = vadd.f32 %v2024_v14, %v177_v21 }
  0xa8   :  { %v333_v37 = vmax.f32 %v277_v29, %v294_v35 }
  0xa9   :  { %v209_v24 = vmax.f32 %v178_v23, 0.0 }
  0xab   :  { %v239_v27 = vrot.slane %v209_v24, 1  ;;  %v295_v28 = vrot.slane %v209_v24, 2 }
  0xad   :  { %v240_v31 = vsel %vm235_vm1, %v237_v20, %v239_v27  ;;  %v296_v36 = vsel %vm291_vm2, %v293_v26, %v295_v28 }
  0xae   :  { %v179_v32 = vpop.f32.mrf.mxu0  ;;  %v278_v33 = vmax.f32 %v208_v18, %v240_v31 }
  0xaf   :  { %v180_v34 = vadd.f32 %v2024_v14, %v179_v32 }
  0xb0   :  { %v334_v38 = vmax.f32 %v278_v33, %v296_v36 }
  0xb1   :  { %v210_v39 = vmax.f32 %v180_v34, 0.0 }
  0xb2   :  { %v2034_v40 = vpack.c.bf16 %v334_v38, %v333_v37 }
  0xb3   :  { %v241_v41 = vrot.slane %v210_v39, 1  ;;  %v297_v46 = vrot.slane %v210_v39, 2 }
  0xb5   :  { %v242_v45 = vsel %vm235_vm1, %v239_v27, %v241_v41  ;;  %v298_v54 = vsel %vm291_vm2, %v295_v28, %v297_v46 }
  0xb6   :  { %v182_v42 = vpop.f32.mrf.mxu0  ;;  %v279_v49 = vmax.f32 %v209_v24, %v242_v45 }
  0xb7   :  { %v183_v43 = vadd.f32 %v2024_v14, %v182_v42 }
  0xb8   :  { %v335_v56 = vmax.f32 %v279_v49, %v298_v54 }
  0xb9   :  { %v211_v44 = vmax.f32 %v183_v43, 0.0 }
  0xbb   :  { %v243_v47 = vrot.slane %v211_v44, 1  ;;  %v299_v48 = vrot.slane %v211_v44, 2 }
  0xbd   :  { %v244_v50 = vsel %vm235_vm1, %v241_v41, %v243_v47  ;;  %v300_v55 = vsel %vm291_vm2, %v297_v46, %v299_v48 }
  0xbe   :  { %v184_v51 = vpop.f32.mrf.mxu0  ;;  %v280_v52 = vmax.f32 %v210_v39, %v244_v50 }
  0xbf   :  { %v185_v53 = vadd.f32 %v2024_v14, %v184_v51 }
  0xc0   :  { %v336_v57 = vmax.f32 %v280_v52, %v300_v55 }
  0xc1   :  { %v212_v58 = vmax.f32 %v185_v53, 0.0 }
  0xc2   :  { %v2042_v59 = vpack.c.bf16 %v336_v57, %v335_v56 }
  0xc3   :  { %v245_v60 = vrot.slane %v212_v58, 1  ;;  %v301_v61 = vrot.slane %v212_v58, 2 }
  0xc5   :  { %v246_v62 = vsel %vm235_vm1, %v243_v47, %v245_v60  ;;  %v302_v63 = vsel %vm291_vm2, %v299_v48, %v301_v61 }
  0xc6   :  { %v187_v0 = vpop.f32.mrf.mxu0  ;;  %v281_v1 = vmax.f32 %v211_v44, %v246_v62 }
  0xc7   :  { %v188_v2 = vadd.f32 %v2024_v14, %v187_v0 }
  0xc8   :  { %v337_v3 = vmax.f32 %v281_v1, %v302_v63 }
  0xc9   :  { %v2047_v4 = vmax.f32 %v188_v2, 0.0 }
  0xcb   :  { %v247_v5 = vrot.slane %v2047_v4, 1  ;;  %v303_v6 = vrot.slane %v2047_v4, 2 }
  0xcd   :  { %v248_v7 = vsel %vm235_vm1, %v245_v60, %v247_v5  ;;  %v304_v8 = vsel %vm291_vm2, %v301_v61, %v303_v6 }
  0xce   :  { %v189_v9 = vpop.f32.mrf.mxu0  ;;  %v282_v10 = vmax.f32 %v212_v58, %v248_v7 }
  0xcf   :  { %v190_v30 = vadd.f32 %v2024_v14, %v189_v9 }
  0xd0   :  { %v338_v11 = vmax.f32 %v282_v10, %v304_v8 }
  0xd1   :  { %v214_v39 = vmax.f32 %v190_v30, 0.0 }
  0xd2   :  { %v2057_v12 = vpack.c.bf16 %v338_v11, %v337_v3 }
  0xd3   :  { %v249_v53 = vrot.slane %v214_v39, 1 }
  0xd5   :  { %v250_v9 = vsel %vm235_vm1, %v247_v5, %v249_v53 }
  0xd6   :  { %v192_v13 = vpop.f32.mrf.mxu0 }
  0xd7   :  { %v193_v27 = vadd.f32 %v2024_v14, %v192_v13 }
  0xd9   :  { %v215_v36 = vmax.f32 %v193_v27, 0.0 }
  0xdb   :  { %v251_v49 = vrot.slane %v215_v36, 1  ;;  %v307_v7 = vrot.slane %v215_v36, 2 }
  0xdd   :  { %v252_v1 = vsel %vm235_vm1, %v249_v53, %v251_v49 }
  0xde   :  { %v194_v15 = vpop.f32.mrf.mxu0  ;;  %v284_v13 = vmax.f32 %v214_v39, %v252_v1 }
  0xdf   :  { %v195_v23 = vadd.f32 %v2024_v14, %v194_v15  ;;  %v305_v15 = vrot.slane %v214_v39, 2 }
  0xe1   :  { %v216_v32 = vmax.f32 %v195_v23, 0.0 }
  0xe3   :  { %v253_v44 = vrot.slane %v216_v32, 1  ;;  %v309_v62 = vrot.slane %v216_v32, 2 }
  0xe5   :  { %v254_v58 = vsel %vm235_vm1, %v251_v49, %v253_v44 }
  0xe6   :  { %v197_v16 = vpop.f32.mrf.mxu0  ;;  %v285_v3 = vmax.f32 %v215_v36, %v254_v58 }
  0xe7   :  { %v198_v21 = vadd.f32 %v2024_v14, %v197_v16  ;;  %v310_v16 = vsel %vm291_vm2, %v307_v7, %v309_v62 }
  0xe9   :  { %v217_v28 = vmax.f32 %v198_v21, 0.0 }
  0xeb   :  { %v255_v37 = vrot.slane %v217_v28, 1  ;;  %v311_v55 = vrot.slane %v217_v28, 2 }
  0xed   :  { %v256_v52 = vsel %vm235_vm1, %v253_v44, %v255_v37  ;;  %v312_v8 = vsel %vm291_vm2, %v309_v62, %v311_v55 }
  0xee   :  { %v199_v17 = vpop.f32.mrf.mxu0  ;;  %v286_v61 = vmax.f32 %v216_v32, %v256_v52 }
  0xef   :  { %v200_v20 = vadd.f32 %v2024_v14, %v199_v17  ;;  %v341_v17 = vmax.f32 %v285_v3, %v310_v16 }
  0xf0   :  { %v342_v11 = vmax.f32 %v286_v61, %v312_v8 }
  0xf1   :  { %v218_v24 = vmax.f32 %v200_v20, 0.0 }
  0xf2   :  { %v351_v20 = vpack.c.bf16 %v342_v11, %v341_v17 }
  0xf3   :  { %v257_v33 = vrot.slane %v218_v24, 1  ;;  %v313_v50 = vrot.slane %v218_v24, 2 }
  0xf5   :  { %v258_v46 = vsel %vm235_vm1, %v255_v37, %v257_v33  ;;  %v314_v0 = vsel %vm291_vm2, %v311_v55, %v313_v50 }
  0xf6   :  { %v202_v18 = vpop.f32.mrf.mxu0  ;;  %v287_v54 = vmax.f32 %v217_v28, %v258_v46 }
  0xf7   :  { %v203_v19 = vadd.f32 %v2024_v14, %v202_v18  ;;  %v283_v18 = vmax.f32 %v2047_v4, %v250_v9  ;;  %v1820_v4 = vld [vmem:[%s2482_s1] sm:$0xff] }
  0xf8   :  { %v343_v2 = vmax.f32 %v287_v54, %v314_v0 }
  0xf9   :  { %v219_v22 = vmax.f32 %v203_v19, 0.0  ;;  %v308_v19 = vsel %vm291_vm2, %v305_v15, %v307_v7 }
  0xfa   :  { %v340_v21 = vmax.f32 %v284_v13, %v308_v19 }
  0xfb   :  { %v259_v29 = vrot.slane %v219_v22, 1  ;;  %v315_v41 = vrot.slane %v219_v22, 2 }
  0xfd   :  { %v260_v38 = vsel %vm235_vm1, %v257_v33, %v259_v29  ;;  %v316_v57 = vsel %vm291_vm2, %v313_v50, %v315_v41 }
  0xfe   :  { %v204_v25 = vpop.f32.mrf.mxu0  ;;  %v288_v48 = vmax.f32 %v218_v24, %v260_v38  ;;  %v1824_v24 = vld [vmem:[%s2482_s1 + $0x20] sm:$0xff] }
  0xff   :  { %v205_v26 = vadd.f32 %v2024_v14, %v204_v25  ;;  %v1826_v25 = vld [vmem:[%s2482_s1 + $0x30] sm:$0xff] }
 0x100   :  { %v344_v60 = vmax.f32 %v288_v48, %v316_v57 }
 0x101   :  { %v220_v31 = vmax.f32 %v205_v26, 0.0 }
 0x102   :  { %v352_v10 = vpack.c.bf16 %v344_v60, %v343_v2 }
 0x103   :  { %v261_v34 = vrot.slane %v220_v31, 1  ;;  %v317_v35 = vrot.slane %v220_v31, 2 }
 0x105   :  { %v290_v42 = vmax.f32 %v220_v31, %v261_v34  ;;  %v262_v43 = vsel %vm235_vm1, %v259_v29, %v261_v34  ;;  %v318_v14 = vsel %vm291_vm2, %v315_v41, %v317_v35 }
 0x106   :  { %v289_v45 = vmax.f32 %v219_v22, %v262_v43  ;;  %v306_v22 = vsel %vm291_vm2, %v303_v6, %v305_v15  ;;  %v1822_v6 = vld [vmem:[%s2482_s1 + $0x10] sm:$0xff] }
 0x107   :  { %v346_v47 = vmax.f32 %v290_v42, %v317_v35  ;;  %v339_v5 = vmax.f32 %v283_v18, %v306_v22 }
 0x108   :  { %v345_v51 = vmax.f32 %v289_v45, %v318_v14 }
 0x109   :  { %v350_v23 = vpack.c.bf16 %v340_v21, %v339_v5 }
 0x10a   :  { %v353_v56 = vpack.c.bf16 %v346_v47, %v345_v51 }
 0x10c   :  { %v426_v63 = vsel %vm235_vm1, %v353_v56, 0 }
 0x10d   :  { %429 = vmatpush.bf16.msra.mxu1 %v426_v63  ;;  %1860 = vmatpush.bf16.msra.mxu2 %v426_v63 }
 0x111   :  { %430 = vmatpush.bf16.msra.mxu1 %v352_v10  ;;  %1861 = vmatpush.bf16.msra.mxu2 %v352_v10 }
 0x115   :  { %431 = vmatpush.bf16.msra.mxu1 %v351_v20  ;;  %1862 = vmatpush.bf16.msra.mxu2 %v351_v20 }
 0x119   :  { %432 = vmatpush.bf16.msra.mxu1 %v350_v23  ;;  %1863 = vmatpush.bf16.msra.mxu2 %v350_v23 }
 0x11d   :  { %433 = vmatpush.bf16.msra.mxu1 %v2057_v12  ;;  %1864 = vmatpush.bf16.msra.mxu2 %v2057_v12  ;;  %v1821_v12 = vld [vmem:[%s2482_s1 + $0x8] sm:$0xff] }
 0x121   :  { %434 = vmatpush.bf16.msra.mxu1 %v2042_v59  ;;  %1865 = vmatpush.bf16.msra.mxu2 %v2042_v59  ;;  %v1823_v59 = vld [vmem:[%s2482_s1 + $0x18] sm:$0xff] }
 0x125   :  { %435 = vmatpush.bf16.msra.mxu1 %v2034_v40  ;;  %1866 = vmatpush.bf16.msra.mxu2 %v2034_v40  ;;  %v1825_v40 = vld [vmem:[%s2482_s1 + $0x28] sm:$0xff]  ;;  %s1910_s1 = smov 64  }
 0x128   :  { %1654 = vmatmul.msk.bf16.vlgmr.msra.gmra.mxu1 %vm403_vm3, %v1820_v4  ;;  %1656 = vmatmul.msk.bf16.vlgmr.msra.gmra.mxu2 %vm403_vm3, %v1822_v6 }
 0x138   :  { %1655 = vmatmul.msk.bf16.gmra.mxu1 %vm403_vm3, %v1821_v12  ;;  %1657 = vmatmul.msk.bf16.gmra.mxu2 %vm403_vm3, %v1823_v59 }
 0x148   :  { %1658 = vmatmul.msk.bf16.gmra.mxu2 %vm403_vm3, %v1824_v24 }
 0x158   :  { %1659 = vmatmul.msk.bf16.gmra.mxu2 %vm403_vm3, %v1825_v40 }
 0x168   :  { %1660 = vmatmul.msk.bf16.gmra.mxu2 %vm403_vm3, %v1826_v25 }
 0x1a5   :  { %v437_v26 = vpop.f32.mrf.mxu1 }
 0x1a6   :  { %v472_v50 = vpack.c.bf16 %v437_v26, %v437_v26 }
 0x1a8   :  { %v500_v58 = vunpack.c.l.b16 %v472_v50 }
 0x1ab   :  { %v447_v27 = vpop.f32.mrf.mxu2 }
 0x1ac   :  { %v476_v31 = vpack.c.bf16 %v447_v27, %v447_v27 }
 0x1ad   :  { %v439_v28 = vpop.f32.mrf.mxu1 }
 0x1ae   :  { %v504_v34 = vunpack.c.l.b16 %v476_v31  ;;  %v473_v45 = vpack.c.bf16 %v439_v28, %v439_v28 }
 0x1b0   :  { %v501_v54 = vunpack.c.l.b16 %v473_v45 }
 0x1b2   :  { %v2130_v63 = vpack.c.b16 %v501_v54, %v500_v58 }
 0x1b3   :  { %v449_v29 = vpop.f32.mrf.mxu2 }
 0x1b4   :  { %v477_v32 = vpack.c.bf16 %v449_v29, %v449_v29  ;;  %v523_v7 = vshrl.u32 %v2130_v63, 16  ;;  %v525_v8 = vshll.u32 %v2130_v63, 16 }
 0x1b5   :  { %v442_v30 = vpop.f32.mrf.mxu1 }
 0x1b6   :  { %v505_v35 = vunpack.c.l.b16 %v477_v32  ;;  %v474_v36 = vpack.c.bf16 %v442_v30, %v442_v30  ;;  %v606_v17 = vrot.slane %v523_v7, 1  ;;  %v607_v18 = vrot.slane %v525_v8, 2 }
 0x1b8   :  { %v2113_v39 = vpack.c.b16 %v505_v35, %v504_v34  ;;  %v502_v41 = vunpack.c.l.b16 %v474_v36  ;;  %v608_v5 = vor.u32 %v607_v18, %v606_v17  ;;  %v527_v18 = vrot.slane %v525_v8, 1  ;;  %v1829_v8 = vld [vmem:[%s2486_s5 + $0x10] sm:$0xff] }
 0x1ba   :  { %v538_v49 = vshll.u32 %v2113_v39, 16  ;;  %v542_v0 = vshrl.u32 %v2113_v39, 16 }
 0x1bb   :  { %v452_v33 = vpop.f32.mrf.mxu2 }
 0x1bc   :  { %v478_v42 = vpack.c.bf16 %v452_v33, %v452_v33  ;;  %v540_v57 = vrot.slane %v538_v49, 1 }
 0x1bd   :  { %v444_v37 = vpop.f32.mrf.mxu1 }
 0x1be   :  { %v475_v38 = vpack.c.bf16 %v444_v37, %v444_v37  ;;  %v506_v14 = vunpack.c.l.b16 %v478_v42  ;;  %v544_v3 = vor.u32 %v542_v0, %v540_v57 }
 0x1c0   :  { %v503_v43 = vunpack.c.l.b16 %v475_v38 }
 0x1c2   :  { %v2115_v44 = vpack.c.b16 %v503_v43, %v502_v41 }
 0x1c3   :  { %v454_v46 = vpop.f32.mrf.mxu2 }
 0x1c4   :  { %v479_v47 = vpack.c.bf16 %v454_v46, %v454_v46  ;;  %v530_v48 = vshll.u32 %v2115_v44, 16  ;;  %v534_v53 = vshrl.u32 %v2115_v44, 16 }
 0x1c6   :  { %v507_v51 = vunpack.c.l.b16 %v479_v47  ;;  %v2119_v52 = vrot.slane %v530_v48, 1  ;;  %v609_v10 = vrot.slane %v534_v53, 1  ;;  %v610_v11 = vrot.slane %v530_v48, 2 }
 0x1c7   :  { %v614_v47 = vrot.slane %v538_v49, 2  ;;  %v1833_v49 = vld [vmem:[%s2486_s5 + $0x30] sm:$0xff] }
 0x1c8   :  { %v2122_v55 = vpack.c.b16 %v507_v51, %v506_v14  ;;  %v536_v56 = vor.u32 %v534_v53, %v2119_v52  ;;  %v611_v20 = vor.u32 %v610_v11, %v609_v10  ;;  %v613_v14 = vrot.slane %v542_v0, 1 }
 0x1ca   :  { %v541_v60 = vsel %vm521_vm4, %v536_v56, %v540_v57  ;;  %v546_v61 = vshll.u32 %v2122_v55, 16  ;;  %v550_v21 = vshrl.u32 %v2122_v55, 16  ;;  %v612_v23 = vsel %vm605_vm5, %v608_v5, %v611_v20  ;;  %v1830_v5 = vld [vmem:[%s2486_s5 + $0x18] sm:$0xff] }
 0x1cb   :  { %v457_v62 = vpop.f32.mrf.mxu2  ;;  %579 = vrot.lane.b32.xlu0 %v541_v60, %s1910_s1  ;;  %v615_v54 = vor.u32 %v614_v47, %v613_v14 }
 0x1cc   :  { %v548_v1 = vrot.slane %v546_v61, 1  ;;  %v480_v2 = vpack.c.bf16 %v457_v62, %v457_v62  ;;  %v617_v59 = vrot.slane %v550_v21, 1  ;;  %v618_v24 = vrot.slane %v546_v61, 2  ;;  %v1834_v61 = vld [vmem:[%s2486_s5 + $0x38] sm:$0xff] }
 0x1cd   :  { %v616_v57 = vsel %vm605_vm5, %v611_v20, %v615_v54  ;;  %1867 = vmatpush.bf16.msra.mxu3 %v1834_v61  ;;  %829 = vmatpush.bf16.msrb.mxu2 %v1834_v61 }
 0x1ce   :  { %v549_v9 = vsel %vm521_vm4, %v544_v3, %v548_v1  ;;  %v508_v15 = vunpack.c.l.b16 %v480_v2  ;;  %v552_v40 = vor.u32 %v550_v21, %v548_v1  ;;  %v2150_v31 = vor.u32 %v618_v24, %v617_v59 }
 0x1cf   :  { %v528_v21 = vor.u32 %v527_v18, %v523_v7  ;;  %v1828_v7 = vld [vmem:[%s2486_s5 + $0x8] sm:$0xff] }
 0x1d1   :  { %1868 = vmatpush.bf16.msra.mxu3 %v1833_v49  ;;  %830 = vmatpush.bf16.msrb.mxu2 %v1833_v49 }
 0x1d3   :  { %v459_v13 = vpop.f32.mrf.mxu2  ;;  %581 = vrot.lane.b32.xlu0 %v549_v9, %s1910_s1 }
 0x1d4   :  { %v481_v16 = vpack.c.bf16 %v459_v13, %v459_v13  ;;  %v1832_v13 = vld [vmem:[%s2486_s5 + $0x28] sm:$0xff] }
 0x1d5   :  { %1869 = vmatpush.bf16.msra.mxu3 %v1832_v13  ;;  %831 = vmatpush.bf16.msrb.mxu2 %v1832_v13 }
 0x1d6   :  { %v509_v19 = vunpack.c.l.b16 %v481_v16 }
 0x1d8   :  { %v2142_v22 = vpack.c.b16 %v509_v19, %v508_v15  ;;  %v1831_v19 = vld [vmem:[%s2486_s5 + $0x20] sm:$0xff] }
 0x1d9   :  { %1870 = vmatpush.bf16.msra.mxu3 %v1831_v19  ;;  %832 = vmatpush.bf16.msrb.mxu2 %v1831_v19 }
 0x1da   :  { %v554_v4 = vshll.u32 %v2142_v22, 16  ;;  %v558_v6 = vshrl.u32 %v2142_v22, 16 }
 0x1db   :  { %v462_v12 = vpop.f32.mrf.mxu2  ;;  %633 = vrot.lane.b32.xlu0 %v612_v23, %s1910_s1  ;;  %v533_v23 = vsel %vm521_vm4, %v528_v21, %v2119_v52  ;;  %v1827_v52 = vld [vmem:[%s2486_s5] sm:$0xff] }
 0x1dc   :  { %v556_v25 = vrot.slane %v554_v4, 1  ;;  %v621_v26 = vrot.slane %v558_v6, 1  ;;  %v622_v27 = vrot.slane %v554_v4, 2  ;;  %v482_v30 = vpack.c.bf16 %v462_v12, %v462_v12 }
 0x1dd   :  { %1871 = vmatpush.bf16.msra.mxu3 %v1830_v5  ;;  %833 = vmatpush.bf16.msrb.mxu2 %v1830_v5  ;;  %v620_v4 = vsel %vm605_vm5, %v615_v54, %v2150_v31 }
 0x1de   :  { %v557_v28 = vsel %vm521_vm4, %v552_v40, %v556_v25  ;;  %v623_v29 = vor.u32 %v622_v27, %v621_v26  ;;  %v510_v34 = vunpack.c.l.b16 %v482_v30  ;;  %v560_v42 = vor.u32 %v558_v6, %v556_v25  ;;  %v1842_v27 = vld [vmem:[%s2486_s5 + $0x78] sm:$0xff]  ;;  %v1840_v30 = vld [vmem:[%s2486_s5 + $0x68] sm:$0xff] }
 0x1df   :  { %583 = vrot.lane.b32.xlu1 %v557_v28, %s1910_s1 }
 0x1e0   :  { %v624_v32 = vsel %vm605_vm5, %v2150_v31, %v623_v29 }
 0x1e1   :  { %1872 = vmatpush.bf16.msra.mxu3 %v1829_v8  ;;  %834 = vmatpush.bf16.msrb.mxu2 %v1829_v8 }
 0x1e3   :  { %v464_v33 = vpop.f32.mrf.mxu2  ;;  %639 = vrot.lane.b32.xlu0 %v624_v32, %s1910_s1  ;;  %v1839_v32 = vld [vmem:[%s2486_s5 + $0x60] sm:$0xff] }
 0x1e4   :  { %v483_v35 = vpack.c.bf16 %v464_v33, %v464_v33 }
 0x1e5   :  { %1873 = vmatpush.bf16.msra.mxu3 %v1828_v7  ;;  %835 = vmatpush.bf16.msrb.mxu2 %v1828_v7 }
 0x1e6   :  { %v511_v36 = vunpack.c.l.b16 %v483_v35 }
 0x1e8   :  { %v2155_v37 = vpack.c.b16 %v511_v36, %v510_v34  ;;  %v1838_v34 = vld [vmem:[%s2486_s5 + $0x58] sm:$0xff]  ;;  %v1837_v36 = vld [vmem:[%s2486_s5 + $0x50] sm:$0xff] }
 0x1e9   :  { %1874 = vmatpush.bf16.msra.mxu3 %v1827_v52  ;;  %836 = vmatpush.bf16.msrb.mxu2 %v1827_v52 }
 0x1ea   :  { %v562_v38 = vshll.u32 %v2155_v37, 16  ;;  %v566_v48 = vshrl.u32 %v2155_v37, 16 }
 0x1eb   :  { %v467_v41 = vpop.f32.mrf.mxu2 }
 0x1ec   :  { %v564_v43 = vrot.slane %v562_v38, 1  ;;  %v484_v46 = vpack.c.bf16 %v467_v41, %v467_v41  ;;  %v625_v58 = vrot.slane %v566_v48, 1  ;;  %v626_v60 = vrot.slane %v562_v38, 2  ;;  %v1836_v38 = vld [vmem:[%s2486_s5 + $0x48] sm:$0xff] }
 0x1ed   :  { %873 = vmatpush.bf16.msrb.mxu3 %v1842_v27 }
 0x1ee   :  { %v565_v45 = vsel %vm521_vm4, %v560_v42, %v564_v43  ;;  %v512_v51 = vunpack.c.l.b16 %v484_v46  ;;  %v627_v1 = vor.u32 %v626_v60, %v625_v58  ;;  %v568_v3 = vor.u32 %v566_v48, %v564_v43  ;;  %v1835_v42 = vld [vmem:[%s2486_s5 + $0x40] sm:$0xff] }
 0x1ef   :  { %585 = vrot.lane.b32.xlu1 %v565_v45, %s1910_s1  ;;  %v593_v48 = vrot.slane %v2115_v44, 1  ;;  %v597_v60 = vrot.slane %v2122_v55, 1 }
 0x1f0   :  { %v628_v16 = vsel %vm605_vm5, %v623_v29, %v627_v1  ;;  %v1841_v29 = vld [vmem:[%s2486_s5 + $0x70] sm:$0xff] }
 0x1f1   :  { %874 = vmatpush.bf16.msrb.mxu3 %v1841_v29 }
 0x1f3   :  { %v469_v50 = vpop.f32.mrf.mxu2 }
 0x1f4   :  { %v485_v53 = vpack.c.bf16 %v469_v50, %v469_v50 }
 0x1f5   :  { %875 = vmatpush.bf16.msrb.mxu3 %v1840_v30 }
 0x1f6   :  { %v513_v56 = vunpack.c.l.b16 %v485_v53 }
 0x1f7   :  { %635 = vrot.lane.b32.xlu1 %v616_v57, %s1910_s1 }
 0x1f8   :  { %v2168_v62 = vpack.c.b16 %v513_v56, %v512_v51  ;;  %v592_v51 = vrot.slane %v2130_v63, 1  ;;  %v595_v56 = vrot.slane %v2113_v39, 1 }
 0x1f9   :  { %876 = vmatpush.bf16.msrb.mxu3 %v1839_v32 }
 0x1fa   :  { %v570_v0 = vshll.u32 %v2168_v62, 16  ;;  %v574_v2 = vshrl.u32 %v2168_v62, 16  ;;  %v594_v53 = vsel %vm235_vm1, %v592_v51, %v593_v48  ;;  %v596_v57 = vsel %vm235_vm1, %v593_v48, %v595_v56 }
 0x1fc   :  { %v572_v9 = vrot.slane %v570_v0, 1  ;;  %v629_v10 = vrot.slane %v574_v2, 1  ;;  %v630_v11 = vrot.slane %v570_v0, 2  ;;  %v599_v0 = vrot.slane %v2142_v22, 1 }
 0x1fd   :  { %877 = vmatpush.bf16.msrb.mxu3 %v1838_v34 }
 0x1fe   :  { %v573_v15 = vsel %vm521_vm4, %v568_v3, %v572_v9  ;;  %v631_v17 = vor.u32 %v630_v11, %v629_v10  ;;  %v576_v20 = vor.u32 %v574_v2, %v572_v9  ;;  %v601_v10 = vrot.slane %v2155_v37, 1 }
 0x1ff   :  { %587 = vrot.lane.b32.xlu2 %v573_v15, %s1910_s1  ;;  %641 = vrot.lane.b32.xlu1 %v628_v16, %s1910_s1  ;;  %v603_v16 = vrot.slane %v2168_v62, 1 }
 0x200   :  { %645 = vrot.lane.b32.xlu0 %v631_v17, %s1910_s1  ;;  %v632_v6 = vsel %vm605_vm5, %v627_v1, %v631_v17  ;;  %v602_v11 = vsel %vm235_vm1, %v599_v0, %v601_v10 }
 0x201   :  { %878 = vmatpush.bf16.msrb.mxu3 %v1837_v36  ;;  %v604_v18 = vsel %vm235_vm1, %v601_v10, %v603_v16 }
 0x205   :  { %879 = vmatpush.bf16.msrb.mxu3 %v1836_v38 }
 0x207   :  { %589 = vrot.lane.b32.xlu2 %v576_v20, %s1910_s1  ;;  %577 = vrot.lane.b32.xlu1 %v533_v23, %s1910_s1 }
 0x209   :  { %880 = vmatpush.bf16.msrb.mxu3 %v1835_v42 }
 0x20f   :  { %637 = vrot.lane.b32.xlu2 %v620_v4, %s1910_s1 }
 0x217   :  { %643 = vrot.lane.b32.xlu2 %v632_v6, %s1910_s1 }
 0x23d   :  { %v580_v12 = vpop.permute.xlu0 %579 }
 0x23e   :  { %v652_v59 = vsel %vm647_vm6, %v2115_v44, %v580_v12  ;;  %v598_v44 = vsel %vm235_vm1, %v595_v56, %v597_v60 }
 0x23f   :  { %842 = vmatmul.bf16.vlgmr.msra.gmra.mxu3 %v652_v59 }
 0x245   :  { %v582_v24 = vpop.permute.xlu0 %581 }
 0x246   :  { %v655_v40 = vsel %vm647_vm6, %v2113_v39, %v582_v24  ;;  %v600_v39 = vsel %vm235_vm1, %v597_v60, %v599_v0 }
 0x24d   :  { %v634_v50 = vpop.permute.xlu0 %633 }
 0x24e   :  { %v671_v54 = vsel %vm647_vm6, %v594_v53, %v634_v50 }
 0x24f   :  { %847 = vmatmul.bf16.gmra.mxu3 %v655_v40 }
 0x251   :  { %v584_v25 = vpop.permute.xlu1 %583 }
 0x252   :  { %v658_v26 = vsel %vm647_vm6, %v2122_v55, %v584_v25 }
 0x255   :  { %v640_v2 = vpop.permute.xlu0 %639 }
 0x256   :  { %v683_v3 = vsel %vm647_vm6, %v600_v39, %v640_v2 }
 0x259   :  { %v588_v45 = vpop.permute.xlu2 %587 }
 0x25a   :  { %v664_v46 = vsel %vm647_vm6, %v2155_v37, %v588_v45 }
 0x25f   :  { %852 = vmatmul.bf16.gmra.mxu3 %v658_v26 }
 0x261   :  { %v586_v28 = vpop.permute.xlu1 %585  ;;  %v590_v14 = vpop.permute.xlu2 %589 }
 0x262   :  { %v661_v33 = vsel %vm647_vm6, %v2142_v22, %v586_v28  ;;  %v667_v47 = vsel %vm647_vm6, %v2168_v62, %v590_v14  ;;  %v1881_v62 = vld [vmem:[%s2487_s6] ss:$0 sm:$0xff] }
 0x269   :  { %v636_v31 = vpop.permute.xlu1 %635  ;;  %v638_v61 = vpop.permute.xlu2 %637 }
 0x26a   :  { %v675_v58 = vsel %vm647_vm6, %v596_v57, %v636_v31  ;;  %v679_v49 = vsel %vm647_vm6, %v598_v44, %v638_v61 }
 0x26f   :  { %857 = vmatmul.bf16.gmra.mxu3 %v661_v33 }
 0x271   :  { %v642_v35 = vpop.permute.xlu1 %641  ;;  %v644_v17 = vpop.permute.xlu2 %643 }
 0x272   :  { %v687_v13 = vsel %vm647_vm6, %v602_v11, %v642_v35  ;;  %v691_v19 = vsel %vm647_vm6, %v604_v18, %v644_v17  ;;  %v646_v5 = vpop.permute.xlu0 %645 }
 0x273   :  { %v695_v37 = vsel %vm647_vm6, %v603_v16, %v646_v5 }
 0x279   :  { %v578_v41 = vpop.permute.xlu1 %577 }
 0x27a   :  { %v649_v43 = vsel %vm647_vm6, %v2130_v63, %v578_v41 }
 0x27b   :  { %837 = vmatmul.bf16.vlgmr.msrb.gmra.mxu2 %v649_v43 }
 0x27f   :  { %862 = vmatmul.bf16.gmra.mxu3 %v664_v46 }
 0x28f   :  { %867 = vmatmul.bf16.gmra.mxu3 %v667_v47 }
 0x29f   :  { %881 = vmatmul.bf16.vlgmr.msrb.gmra.mxu3 %v671_v54 }
 0x2af   :  { %886 = vmatmul.bf16.gmra.mxu3 %v675_v58 }
 0x2bf   :  { %891 = vmatmul.bf16.gmra.mxu3 %v679_v49 }
 0x2c2   :  { %v843_v63 = vpop.f32.mrf.mxu3 }
 0x2c3   :  { %v844_v30 = vadd.f32 %v1881_v62, %v843_v63 }
 0x2ca   :  { %v845_v1 = vpop.f32.mrf.mxu3 }
 0x2cb   :  { %v846_v33 = vadd.f32 %v1881_v62, %v845_v1 }
 0x2cf   :  { %896 = vmatmul.bf16.gmra.mxu3 %v683_v3 }
 0x2d2   :  { %v848_v9 = vpop.f32.mrf.mxu3 }
 0x2d3   :  { %v849_v42 = vadd.f32 %v1881_v62, %v848_v9 }
 0x2da   :  { %v850_v55 = vpop.f32.mrf.mxu3 }
 0x2db   :  { %v851_v46 = vadd.f32 %v1881_v62, %v850_v55 }
 0x2df   :  { %901 = vmatmul.bf16.gmra.mxu3 %v687_v13 }
 0x2e2   :  { %v853_v15 = vpop.f32.mrf.mxu3 }
 0x2e3   :  { %v854_v53 = vadd.f32 %v1881_v62, %v853_v15 }
 0x2ea   :  { %v855_v22 = vpop.f32.mrf.mxu3 }
 0x2eb   :  { %v856_v57 = vadd.f32 %v1881_v62, %v855_v22 }
 0x2ef   :  { %906 = vmatmul.bf16.gmra.mxu3 %v691_v19 }
 0x2f2   :  { %v858_v20 = vpop.f32.mrf.mxu3 }
 0x2f3   :  { %v859_v0 = vadd.f32 %v1881_v62, %v858_v20 }
 0x2fa   :  { %v860_v21 = vpop.f32.mrf.mxu3 }
 0x2fb   :  { %v861_v1 = vadd.f32 %v1881_v62, %v860_v21 }
 0x2fe   :  { %v838_v52 = vpop.f32.mrf.mxu2 }
 0x2ff   :  { %911 = vmatmul.bf16.gmra.mxu3 %v695_v37  ;;  %v839_v59 = vadd.f32 %v1881_v62, %v838_v52 }
 0x302   :  { %v863_v23 = vpop.f32.mrf.mxu3 }
 0x303   :  { %v864_v13 = vadd.f32 %v1881_v62, %v863_v23 }
 0x306   :  { %v840_v12 = vpop.f32.mrf.mxu2 }
 0x307   :  { %v841_v24 = vadd.f32 %v1881_v62, %v840_v12 }
 0x30a   :  { %v865_v8 = vpop.f32.mrf.mxu3 }
 0x30b   :  { %v866_v15 = vadd.f32 %v1881_v62, %v865_v8 }
 0x312   :  { %v868_v7 = vpop.f32.mrf.mxu3 }
 0x313   :  { %v869_v52 = vadd.f32 %v1881_v62, %v868_v7  ;;  %v1843_v7 = vld [vmem:[%s2483_s2] sm:$0xff] }
 0x31a   :  { %v870_v4 = vpop.f32.mrf.mxu3 }
 0x322   :  { %v882_v6 = vpop.f32.mrf.mxu3 }
 0x323   :  { %v883_v40 = vadd.f32 %v882_v6, %v839_v59  ;;  %v871_v6 = vadd.f32 %v1881_v62, %v870_v4  ;;  %v1911_v59 = vmov 65535   ;;  %v1844_v4 = vld [vmem:[%s2483_s2 + $0x8] sm:$0xff]  ;;  %v1845_v62 = vld [vmem:[%s2483_s2 + $0x10] sm:$0xff] }
 0x325   :  { %v917_v27 = vmax.f32 %v883_v40, 0.0 }
 0x32a   :  { %v884_v25 = vpop.f32.mrf.mxu3 }
 0x32b   :  { %v885_v26 = vadd.f32 %v884_v25, %v841_v24  ;;  %v1009_v24 = vsel %vm291_vm2, 4294967295, %v1911_v59 }
 0x32c   :  { %v1010_v23 = vsel %vm235_vm1, %v1009_v24, 0 }
 0x32d   :  { %v918_v28 = vmax.f32 %v885_v26, 0.0 }
 0x32f   :  { %v2272_v29 = vpack.c.bf16 %v918_v28, %v917_v27  ;;  %v1846_v27 = vld [vmem:[%s2483_s2 + $0x18] sm:$0xff]  ;;  %v1847_v28 = vld [vmem:[%s2483_s2 + $0x20] sm:$0xff] }
 0x332   :  { %v887_v31 = vpop.f32.mrf.mxu3 }
 0x333   :  { %v888_v32 = vadd.f32 %v887_v31, %v844_v30  ;;  %v1849_v30 = vld [vmem:[%s2483_s2 + $0x30] sm:$0xff]  ;;  %v1859_v31 = vld [vmem:[%s2488_s7 + $0x48] sm:$0xff] }
 0x334   :  { %1455 = vmatpush.bf16.msra.mxu2 %v1859_v31 }
 0x335   :  { %v919_v36 = vmax.f32 %v888_v32, 0.0  ;;  %v1858_v32 = vld [vmem:[%s2488_s7 + $0x40] sm:$0xff] }
 0x338   :  { %1456 = vmatpush.bf16.msra.mxu2 %v1858_v32 }
 0x33a   :  { %v889_v34 = vpop.f32.mrf.mxu3 }
 0x33b   :  { %v890_v35 = vadd.f32 %v889_v34, %v846_v33 }
 0x33d   :  { %v920_v38 = vmax.f32 %v890_v35, 0.0 }
 0x33f   :  { %v946_v41 = vpack.c.bf16 %v920_v38, %v919_v36 }
 0x342   :  { %v892_v43 = vpop.f32.mrf.mxu3 }
 0x343   :  { %v893_v45 = vadd.f32 %v892_v43, %v849_v42 }
 0x345   :  { %v921_v48 = vmax.f32 %v893_v45, 0.0 }
 0x34a   :  { %v894_v14 = vpop.f32.mrf.mxu3 }
 0x34b   :  { %v895_v47 = vadd.f32 %v894_v14, %v851_v46 }
 0x34d   :  { %v922_v50 = vmax.f32 %v895_v47, 0.0 }
 0x34f   :  { %v947_v51 = vpack.c.bf16 %v922_v50, %v921_v48 }
 0x352   :  { %v897_v54 = vpop.f32.mrf.mxu3 }
 0x353   :  { %v898_v56 = vadd.f32 %v897_v54, %v854_v53 }
 0x355   :  { %v923_v61 = vmax.f32 %v898_v56, 0.0 }
 0x35a   :  { %v899_v58 = vpop.f32.mrf.mxu3 }
 0x35b   :  { %v900_v60 = vadd.f32 %v899_v58, %v856_v57 }
 0x35d   :  { %v924_v44 = vmax.f32 %v900_v60, 0.0 }
 0x35f   :  { %v948_v49 = vpack.c.bf16 %v924_v44, %v923_v61 }
 0x362   :  { %v902_v63 = vpop.f32.mrf.mxu3 }
 0x363   :  { %v903_v2 = vadd.f32 %v902_v63, %v859_v0 }
 0x365   :  { %v925_v9 = vmax.f32 %v903_v2, 0.0 }
 0x36a   :  { %v904_v39 = vpop.f32.mrf.mxu3 }
 0x36b   :  { %v905_v3 = vadd.f32 %v904_v39, %v861_v1 }
 0x36d   :  { %v926_v10 = vmax.f32 %v905_v3, 0.0 }
 0x36f   :  { %v949_v55 = vpack.c.bf16 %v926_v10, %v925_v9 }
 0x372   :  { %v907_v11 = vpop.f32.mrf.mxu3 }
 0x373   :  { %v908_v16 = vadd.f32 %v907_v11, %v864_v13 }
 0x375   :  { %v927_v18 = vmax.f32 %v908_v16, 0.0 }
 0x37a   :  { %v909_v17 = vpop.f32.mrf.mxu3 }
 0x37b   :  { %v910_v22 = vadd.f32 %v909_v17, %v866_v15 }
 0x37d   :  { %v928_v19 = vmax.f32 %v910_v22, 0.0 }
 0x37f   :  { %v950_v5 = vpack.c.bf16 %v928_v19, %v927_v18 }
 0x382   :  { %v912_v37 = vpop.f32.mrf.mxu3 }
 0x383   :  { %v913_v20 = vadd.f32 %v912_v37, %v869_v52 }
 0x385   :  { %v929_v40 = vmax.f32 %v913_v20, 0.0 }
 0x38a   :  { %v914_v21 = vpop.f32.mrf.mxu3 }
 0x38b   :  { %v915_v12 = vadd.f32 %v914_v21, %v871_v6 }
 0x38d   :  { %v930_v25 = vmax.f32 %v915_v12, 0.0 }
 0x38f   :  { %v951_v8 = vpack.c.bf16 %v930_v25, %v929_v40 }
 0x391   :  { %v1012_v26 = vand.u32 %v1010_v23, %v951_v8 }
 0x393   :  { %1015 = vmatpush.bf16.msrb.mxu0 %v1012_v26 }
 0x397   :  { %1016 = vmatpush.bf16.msrb.mxu0 %v950_v5 }
 0x39b   :  { %1017 = vmatpush.bf16.msrb.mxu0 %v949_v55 }
 0x39f   :  { %1018 = vmatpush.bf16.msrb.mxu0 %v948_v49 }
 0x3a3   :  { %1019 = vmatpush.bf16.msrb.mxu0 %v947_v51 }
 0x3a7   :  { %1020 = vmatpush.bf16.msrb.mxu0 %v946_v41 }
 0x3ab   :  { %1021 = vmatpush.bf16.msrb.mxu0 %v2272_v29  ;;  %v1848_v29 = vld [vmem:[%s2483_s2 + $0x28] sm:$0xff]  ;;  %s1912_s2 = smov 32  }
 0x3ae   :  { %1753 = vmatmul.msk.bf16.vlgmr.msrb.gmra.mxu0 %vm987_vm7, %v1843_v7 }
 0x3be   :  { %1754 = vmatmul.msk.bf16.gmra.mxu0 %vm987_vm7, %v1844_v4 }
 0x3ce   :  { %1755 = vmatmul.msk.bf16.gmra.mxu0 %vm987_vm7, %v1845_v62 }
 0x3de   :  { %1756 = vmatmul.msk.bf16.gmra.mxu0 %vm987_vm7, %v1846_v27 }
 0x3ee   :  { %1757 = vmatmul.msk.bf16.gmra.mxu0 %vm987_vm7, %v1847_v28 }
 0x3fe   :  { %1758 = vmatmul.msk.bf16.gmra.mxu0 %vm987_vm7, %v1848_v29 }
 0x40e   :  { %1759 = vmatmul.msk.bf16.gmra.mxu0 %vm987_vm7, %v1849_v30 }
 0x42b   :  { %v1023_v33 = vpop.f32.mrf.mxu0 }
 0x42c   :  { %v1058_v36 = vpack.c.bf16 %v1023_v33, %v1023_v33 }
 0x42e   :  { %v1086_v42 = vunpack.c.l.b16 %v1058_v36 }
 0x433   :  { %v1025_v34 = vpop.f32.mrf.mxu0 }
 0x434   :  { %v1059_v35 = vpack.c.bf16 %v1025_v34, %v1025_v34 }
 0x436   :  { %v1087_v41 = vunpack.c.l.b16 %v1059_v35 }
 0x438   :  { %v2304_v43 = vpack.c.b16 %v1087_v41, %v1086_v42 }
 0x43a   :  { %v1110_v47 = vshll.u32 %v2304_v43, 16  ;;  %v1108_v51 = vshrl.u32 %v2304_v43, 16  ;;  %v1176_v56 = vrot.slane %v2304_v43, 1  ;;  %v1245_v0 = vrot.slane %v2304_v43, 2 }
 0x43b   :  { %v1028_v38 = vpop.f32.mrf.mxu0 }
 0x43c   :  { %v1060_v45 = vpack.c.bf16 %v1028_v38, %v1028_v38  ;;  %v1112_v54 = vrot.slane %v1110_v47, 1  ;;  %v1203_v49 = vrot.slane %v1108_v51, 1  ;;  %v1204_v63 = vrot.slane %v1110_v47, 2 }
 0x43e   :  { %v1088_v48 = vunpack.c.l.b16 %v1060_v45  ;;  %v1113_v2 = vor.u32 %v1112_v54, %v1108_v51  ;;  %v1205_v11 = vor.u32 %v1204_v63, %v1203_v49 }
 0x443   :  { %v1030_v46 = vpop.f32.mrf.mxu0 }
 0x444   :  { %v1061_v14 = vpack.c.bf16 %v1030_v46, %v1030_v46 }
 0x446   :  { %v1089_v50 = vunpack.c.l.b16 %v1061_v14 }
 0x448   :  { %v2308_v53 = vpack.c.b16 %v1089_v50, %v1088_v48 }
 0x44a   :  { %v1177_v57 = vrot.slane %v2308_v53, 1  ;;  %v1115_v58 = vshll.u32 %v2308_v53, 16  ;;  %v1119_v60 = vshrl.u32 %v2308_v53, 16  ;;  %v1246_v61 = vrot.slane %v2308_v53, 2 }
 0x44b   :  { %v1033_v44 = vpop.f32.mrf.mxu0 }
 0x44c   :  { %v1178_v1 = vsel %vm235_vm1, %v1176_v56, %v1177_v57  ;;  %v1117_v39 = vrot.slane %v1115_v58, 1  ;;  %v1206_v3 = vrot.slane %v1119_v60, 1  ;;  %v1207_v9 = vrot.slane %v1115_v58, 2 }
 0x44d   :  { %1189 = vrot.lane.b32.xlu0 %v1178_v1, %s1910_s1  ;;  %v1247_v10 = vsel %vm291_vm2, %v1245_v0, %v1246_v61  ;;  %v1062_v16 = vpack.c.bf16 %v1033_v44, %v1033_v44 }
 0x44e   :  { %v1118_v55 = vsel %vm521_vm4, %v1113_v2, %v1117_v39  ;;  %1800 = vmatmul.msk.bf16.vlgmr.msra.gmra.mxu2 %vm1258_vm8, %v1247_v10  ;;  %v1208_v13 = vor.u32 %v1207_v9, %v1206_v3  ;;  %v1121_v59 = vor.u32 %v1119_v60, %v1117_v39 }
 0x44f   :  { %1162 = vrot.lane.b32.xlu2 %v1118_v55, %s1912_s2  ;;  %v1090_v18 = vunpack.c.l.b16 %v1062_v16 }
 0x450   :  { %v1209_v15 = vsel %vm605_vm5, %v1205_v11, %v1208_v13 }
 0x451   :  { %1230 = vrot.lane.b32.xlu1 %v1209_v15, %s1913_s23 }
 0x453   :  { %v1035_v17 = vpop.f32.mrf.mxu0 }
 0x454   :  { %v1063_v22 = vpack.c.bf16 %v1035_v17, %v1035_v17 }
 0x456   :  { %v1091_v19 = vunpack.c.l.b16 %v1063_v22 }
 0x458   :  { %v2324_v5 = vpack.c.b16 %v1091_v19, %v1090_v18 }
 0x45a   :  { %v1179_v37 = vrot.slane %v2324_v5, 1  ;;  %v1123_v52 = vshll.u32 %v2324_v5, 16  ;;  %v1127_v6 = vshrl.u32 %v2324_v5, 16  ;;  %v1248_v20 = vrot.slane %v2324_v5, 2 }
 0x45b   :  { %v1038_v21 = vpop.f32.mrf.mxu0 }
 0x45c   :  { %v1180_v12 = vsel %vm235_vm1, %v1177_v57, %v1179_v37  ;;  %v1125_v24 = vrot.slane %v1123_v52, 1  ;;  %v1210_v40 = vrot.slane %v1127_v6, 1  ;;  %v1211_v25 = vrot.slane %v1123_v52, 2 }
 0x45d   :  { %1191 = vrot.lane.b32.xlu0 %v1180_v12, %s1910_s1  ;;  %v1249_v23 = vsel %vm291_vm2, %v1246_v61, %v1248_v20  ;;  %v1064_v4 = vpack.c.bf16 %v1038_v21, %v1038_v21  ;;  %v1855_v12 = vld [vmem:[%s2488_s7 + $0x28] sm:$0xff] }
 0x45e   :  { %v1126_v8 = vsel %vm521_vm4, %v1121_v59, %v1125_v24  ;;  %1801 = vmatmul.msk.bf16.gmra.mxu2 %vm1258_vm8, %v1249_v23  ;;  %v1212_v26 = vor.u32 %v1211_v25, %v1210_v40  ;;  %v1129_v38 = vor.u32 %v1127_v6, %v1125_v24 }
 0x45f   :  { %1164 = vrot.lane.b32.xlu2 %v1126_v8, %s1912_s2  ;;  %v1092_v28 = vunpack.c.l.b16 %v1064_v4 }
 0x460   :  { %v1213_v7 = vsel %vm605_vm5, %v1208_v13, %v1212_v26  ;;  %v1857_v13 = vld [vmem:[%s2488_s7 + $0x38] sm:$0xff] }
 0x461   :  { %1232 = vrot.lane.b32.xlu1 %v1213_v7, %s1913_s23  ;;  %1413 = vmatpush.bf16.msrb.mxu1 %v1857_v13 }
 0x463   :  { %v1040_v62 = vpop.f32.mrf.mxu0 }
 0x464   :  { %v1065_v27 = vpack.c.bf16 %v1040_v62, %v1040_v62  ;;  %v1854_v62 = vld [vmem:[%s2488_s7 + $0x20] sm:$0xff] }
 0x466   :  { %v1093_v29 = vunpack.c.l.b16 %v1065_v27 }
 0x468   :  { %v2338_v30 = vpack.c.b16 %v1093_v29, %v1092_v28 }
 0x46a   :  { %v1181_v31 = vrot.slane %v2338_v30, 1  ;;  %v1131_v32 = vshll.u32 %v2338_v30, 16  ;;  %v1135_v33 = vshrl.u32 %v2338_v30, 16  ;;  %v1250_v34 = vrot.slane %v2338_v30, 2 }
 0x46b   :  { %v1043_v35 = vpop.f32.mrf.mxu0 }
 0x46c   :  { %v1182_v36 = vsel %vm235_vm1, %v1179_v37, %v1181_v31  ;;  %v1133_v41 = vrot.slane %v1131_v32, 1  ;;  %v1214_v42 = vrot.slane %v1135_v33, 1  ;;  %v1215_v45 = vrot.slane %v1131_v32, 2  ;;  %v1856_v37 = vld [vmem:[%s2488_s7 + $0x30] sm:$0xff] }
 0x46d   :  { %1193 = vrot.lane.b32.xlu0 %v1182_v36, %s1910_s1  ;;  %v1251_v46 = vsel %vm291_vm2, %v1248_v20, %v1250_v34  ;;  %v1066_v50 = vpack.c.bf16 %v1043_v35, %v1043_v35  ;;  %1414 = vmatpush.bf16.msrb.mxu1 %v1856_v37  ;;  %v1852_v36 = vld [vmem:[%s2488_s7 + $0x10] sm:$0xff] }
 0x46e   :  { %v1134_v14 = vsel %vm521_vm4, %v1129_v38, %v1133_v41  ;;  %1802 = vmatmul.msk.bf16.gmra.mxu2 %vm1258_vm8, %v1251_v46  ;;  %v1216_v47 = vor.u32 %v1215_v45, %v1214_v42  ;;  %v1137_v1 = vor.u32 %v1135_v33, %v1133_v41 }
 0x46f   :  { %1166 = vrot.lane.b32.xlu2 %v1134_v14, %s1912_s2  ;;  %v1094_v56 = vunpack.c.l.b16 %v1066_v50  ;;  %v1851_v14 = vld [vmem:[%s2488_s7 + $0x8] sm:$0xff] }
 0x470   :  { %v1217_v48 = vsel %vm605_vm5, %v1212_v26, %v1216_v47 }
 0x471   :  { %1234 = vrot.lane.b32.xlu1 %v1217_v48, %s1913_s23  ;;  %1415 = vmatpush.bf16.msrb.mxu1 %v1855_v12 }
 0x473   :  { %v1045_v51 = vpop.f32.mrf.mxu0 }
 0x474   :  { %v1067_v54 = vpack.c.bf16 %v1045_v51, %v1045_v51 }
 0x475   :  { %1416 = vmatpush.bf16.msrb.mxu1 %v1854_v62 }
 0x476   :  { %v1095_v57 = vunpack.c.l.b16 %v1067_v54 }
 0x478   :  { %v2352_v58 = vpack.c.b16 %v1095_v57, %v1094_v56 }
 0x47a   :  { %v1183_v60 = vrot.slane %v2352_v58, 1  ;;  %v1139_v61 = vshll.u32 %v2352_v58, 16  ;;  %v1143_v44 = vshrl.u32 %v2352_v58, 16  ;;  %v1252_v49 = vrot.slane %v2352_v58, 2 }
 0x47b   :  { %v1048_v63 = vpop.f32.mrf.mxu0 }
 0x47c   :  { %v1184_v0 = vsel %vm235_vm1, %v1181_v31, %v1183_v60  ;;  %v1141_v2 = vrot.slane %v1139_v61, 1  ;;  %v1218_v39 = vrot.slane %v1143_v44, 1  ;;  %v1219_v3 = vrot.slane %v1139_v61, 2  ;;  %v1853_v31 = vld [vmem:[%s2488_s7 + $0x18] sm:$0xff]  ;;  %v1850_v61 = vld [vmem:[%s2488_s7] sm:$0xff] }
 0x47d   :  { %1195 = vrot.lane.b32.xlu0 %v1184_v0, %s1910_s1  ;;  %v1253_v9 = vsel %vm291_vm2, %v1250_v34, %v1252_v49  ;;  %v1068_v15 = vpack.c.bf16 %v1048_v63, %v1048_v63  ;;  %1417 = vmatpush.bf16.msrb.mxu1 %v1853_v31 }
 0x47e   :  { %v1142_v10 = vsel %vm521_vm4, %v1137_v1, %v1141_v2  ;;  %1803 = vmatmul.msk.bf16.gmra.mxu2 %vm1258_vm8, %v1253_v9  ;;  %v1220_v55 = vor.u32 %v1219_v3, %v1218_v39  ;;  %v1145_v40 = vor.u32 %v1143_v44, %v1141_v2 }
 0x47f   :  { %1168 = vrot.lane.b32.xlu2 %v1142_v10, %s1912_s2  ;;  %v1096_v22 = vunpack.c.l.b16 %v1068_v15 }
 0x480   :  { %v1221_v11 = vsel %vm605_vm5, %v1216_v47, %v1220_v55 }
 0x481   :  { %1236 = vrot.lane.b32.xlu1 %v1221_v11, %s1913_s23  ;;  %1418 = vmatpush.bf16.msrb.mxu1 %v1852_v36 }
 0x483   :  { %v1050_v16 = vpop.f32.mrf.mxu0 }
 0x484   :  { %v1069_v17 = vpack.c.bf16 %v1050_v16, %v1050_v16 }
 0x485   :  { %1419 = vmatpush.bf16.msrb.mxu1 %v1851_v14 }
 0x486   :  { %v1097_v18 = vunpack.c.l.b16 %v1069_v17 }
 0x488   :  { %v2369_v19 = vpack.c.b16 %v1097_v18, %v1096_v22 }
 0x489   :  { %1420 = vmatpush.bf16.msrb.mxu1 %v1850_v61 }
 0x48a   :  { %v1185_v52 = vrot.slane %v2369_v19, 1  ;;  %v1147_v6 = vshll.u32 %v2369_v19, 16  ;;  %v1151_v20 = vshrl.u32 %v2369_v19, 16  ;;  %v1254_v59 = vrot.slane %v2369_v19, 2 }
 0x48b   :  { %v1053_v21 = vpop.f32.mrf.mxu0 }
 0x48c   :  { %v1186_v24 = vsel %vm235_vm1, %v1183_v60, %v1185_v52  ;;  %v1149_v25 = vrot.slane %v1147_v6, 1  ;;  %v1222_v23 = vrot.slane %v1151_v20, 1  ;;  %v1223_v8 = vrot.slane %v1147_v6, 2 }
 0x48d   :  { %1197 = vrot.lane.b32.xlu0 %v1186_v24, %s1910_s1  ;;  %v1255_v26 = vsel %vm291_vm2, %v1252_v49, %v1254_v59  ;;  %v1070_v27 = vpack.c.bf16 %v1053_v21, %v1053_v21 }
 0x48e   :  { %v1150_v7 = vsel %vm521_vm4, %v1145_v40, %v1149_v25  ;;  %1804 = vmatmul.msk.bf16.gmra.mxu2 %vm1258_vm8, %v1255_v26  ;;  %v1224_v4 = vor.u32 %v1223_v8, %v1222_v23  ;;  %v1153_v46 = vor.u32 %v1151_v20, %v1149_v25 }
 0x48f   :  { %1170 = vrot.lane.b32.xlu2 %v1150_v7, %s1912_s2  ;;  %v1098_v32 = vunpack.c.l.b16 %v1070_v27 }
 0x490   :  { %v1225_v28 = vsel %vm605_vm5, %v1220_v55, %v1224_v4 }
 0x491   :  { %1238 = vrot.lane.b32.xlu1 %v1225_v28, %s1913_s23 }
 0x493   :  { %v1055_v29 = vpop.f32.mrf.mxu0 }
 0x494   :  { %v1071_v33 = vpack.c.bf16 %v1055_v29, %v1055_v29 }
 0x496   :  { %v1099_v34 = vunpack.c.l.b16 %v1071_v33 }
 0x498   :  { %v2395_v35 = vpack.c.b16 %v1099_v34, %v1098_v32 }
 0x49a   :  { %v1187_v38 = vrot.slane %v2395_v35, 1  ;;  %v1155_v41 = vshll.u32 %v2395_v35, 16  ;;  %v1159_v42 = vshrl.u32 %v2395_v35, 16  ;;  %v1256_v45 = vrot.slane %v2395_v35, 2 }
 0x49c   :  { %v1188_v47 = vsel %vm235_vm1, %v1185_v52, %v1187_v38  ;;  %v1157_v48 = vrot.slane %v1155_v41, 1  ;;  %v1226_v50 = vrot.slane %v1159_v42, 1  ;;  %v1227_v51 = vrot.slane %v1155_v41, 2 }
 0x49d   :  { %1199 = vrot.lane.b32.xlu0 %v1188_v47, %s1910_s1  ;;  %v1257_v54 = vsel %vm291_vm2, %v1254_v59, %v1256_v45 }
 0x49e   :  { %v1158_v56 = vsel %vm521_vm4, %v1153_v46, %v1157_v48  ;;  %v1228_v57 = vor.u32 %v1227_v51, %v1226_v50  ;;  %1805 = vmatmul.msk.bf16.gmra.mxu2 %vm1258_vm8, %v1257_v54  ;;  %v1161_v44 = vor.u32 %v1159_v42, %v1157_v48  ;;  %v1882_v51 = vld [vmem:[%s2489_s8] ss:$0 sm:$0xff] }
 0x49f   :  { %1172 = vrot.lane.b32.xlu2 %v1158_v56, %s1912_s2 }
 0x4a0   :  { %v1229_v60 = vsel %vm605_vm5, %v1224_v4, %v1228_v57 }
 0x4a1   :  { %1240 = vrot.lane.b32.xlu1 %v1229_v60, %s1913_s23 }
 0x4a5   :  { %1201 = vrot.lane.b32.xlu0 %v1187_v38, %s1910_s1 }
 0x4a7   :  { %1174 = vrot.lane.b32.xlu2 %v1161_v44, %s1912_s2  ;;  %s1556_s2 = sshll.u32 %s1914_s22, 4  ;;  %s1557_s2 = int_to_ptr.vmem [resolvable:$true] %s1556_s2 }
 0x4a9   :  { %1242 = vrot.lane.b32.xlu1 %v1228_v57, %s1913_s23  ;;  %v1163_v49 = vpop.permute.xlu2 %1162 }
 0x4aa   :  { %v1260_v0 = vsel %vm1258_vm8, %v2304_v43, %v1163_v49 }
 0x4ae   :  { %1806 = vmatmul.msk.bf16.gmra.mxu2 %vm1258_vm8, %v1256_v45 }
 0x4b9   :  { %v1165_v3 = vpop.permute.xlu2 %1164 }
 0x4ba   :  { %v1262_v55 = vsel %vm1258_vm8, %v2308_v53, %v1165_v3 }
 0x4bf   :  { %v1190_v63 = vpop.permute.xlu0 %1189 }
 0x4c0   :  { %v1274_v1 = vsel %vm647_vm6, %v1260_v0, %v1190_v63 }
 0x4c3   :  { %v1231_v2 = vpop.permute.xlu1 %1230 }
 0x4c4   :  { %v1288_v39 = vsel %vm141_vm0, %v1274_v1, %v1231_v2 }
 0x4c5   :  { %1421 = vmatmul.bf16.vlgmr.msrb.gmra.mxu1 %v1288_v39 }
 0x4c9   :  { %v1167_v43 = vpop.permute.xlu2 %1166 }
 0x4ca   :  { %v1264_v18 = vsel %vm1258_vm8, %v2324_v5, %v1167_v43 }
 0x4cf   :  { %v1192_v9 = vpop.permute.xlu0 %1191 }
 0x4d0   :  { %v1276_v11 = vsel %vm647_vm6, %v1262_v55, %v1192_v9 }
 0x4d1   :  { %v1458_v10 = vpop.f32.mrf.mxu2 }
 0x4d3   :  { %v1233_v13 = vpop.permute.xlu1 %1232 }
 0x4d4   :  { %v1291_v15 = vsel %vm141_vm0, %v1276_v11, %v1233_v13 }
 0x4d5   :  { %1426 = vmatmul.bf16.gmra.mxu1 %v1291_v15 }
 0x4d9   :  { %v1460_v16 = vpop.f32.mrf.mxu2  ;;  %v1169_v20 = vpop.permute.xlu2 %1168 }
 0x4da   :  { %v1266_v59 = vsel %vm1258_vm8, %v2338_v30, %v1169_v20 }
 0x4df   :  { %v1194_v17 = vpop.permute.xlu0 %1193 }
 0x4e0   :  { %v1278_v37 = vsel %vm647_vm6, %v1264_v18, %v1194_v17 }
 0x4e1   :  { %v2430_v22 = vpop.f32.mrf.mxu2 }
 0x4e3   :  { %v1235_v52 = vpop.permute.xlu1 %1234 }
 0x4e4   :  { %v1294_v6 = vsel %vm141_vm0, %v1278_v37, %v1235_v52 }
 0x4e5   :  { %1430 = vmatmul.bf16.gmra.mxu1 %v1294_v6 }
 0x4e9   :  { %v1465_v53 = vpop.f32.mrf.mxu2  ;;  %v1171_v23 = vpop.permute.xlu2 %1170 }
 0x4ea   :  { %v1268_v7 = vsel %vm1258_vm8, %v2352_v58, %v1171_v23 }
 0x4ef   :  { %v1196_v21 = vpop.permute.xlu0 %1195 }
 0x4f0   :  { %v1280_v24 = vsel %vm647_vm6, %v1266_v59, %v1196_v21 }
 0x4f1   :  { %v1467_v12 = vpop.f32.mrf.mxu2 }
 0x4f3   :  { %v1237_v40 = vpop.permute.xlu1 %1236 }
 0x4f4   :  { %v1297_v25 = vsel %vm141_vm0, %v1280_v24, %v1237_v40 }
 0x4f5   :  { %1433 = vmatmul.bf16.gmra.mxu1 %v1297_v25 }
 0x4f9   :  { %v1468_v5 = vpop.f32.mrf.mxu2  ;;  %v1173_v28 = vpop.permute.xlu2 %1172 }
 0x4fa   :  { %v1270_v32 = vsel %vm1258_vm8, %v2369_v19, %v1173_v28 }
 0x4ff   :  { %v1198_v8 = vpop.permute.xlu0 %1197 }
 0x500   :  { %v1282_v4 = vsel %vm647_vm6, %v1268_v7, %v1198_v8 }
 0x501   :  { %v1470_v26 = vpop.f32.mrf.mxu2  ;;  %v1175_v38 = vpop.permute.xlu2 %1174 }
 0x502   :  { %v1272_v46 = vsel %vm1258_vm8, %v2395_v35, %v1175_v38 }
 0x503   :  { %v1239_v62 = vpop.permute.xlu1 %1238 }
 0x504   :  { %v1300_v27 = vsel %vm141_vm0, %v1282_v4, %v1239_v62  ;;  %v1510_v62 = vld [vmem:[%s2490_s9] sm:$0xff] }
 0x505   :  { %1437 = vmatmul.bf16.gmra.mxu1 %v1300_v27 }
 0x509   :  { %v1471_v30 = vpop.f32.mrf.mxu2 }
 0x50f   :  { %v1200_v29 = vpop.permute.xlu0 %1199 }
 0x510   :  { %v1284_v33 = vsel %vm647_vm6, %v1270_v32, %v1200_v29  ;;  %v1512_v32 = vld [vmem:[%s2490_s9 + $0x10] sm:$0x7f] }
 0x511   :  { %v1474_v31 = vpop.f32.mrf.mxu2 }
 0x513   :  { %v1241_v34 = vpop.permute.xlu1 %1240 }
 0x514   :  { %v1303_v36 = vsel %vm141_vm0, %v1284_v33, %v1241_v34 }
 0x515   :  { %1442 = vmatmul.bf16.gmra.mxu1 %v1303_v36 }
 0x517   :  { %v1202_v41 = vpop.permute.xlu0 %1201 }
 0x518   :  { %v1286_v14 = vsel %vm647_vm6, %v1272_v46, %v1202_v41 }
 0x519   :  { %v1476_v58 = vpop.f32.mrf.mxu2 }
 0x51b   :  { %v1243_v45 = vpop.permute.xlu1 %1242 }
 0x51c   :  { %v1306_v47 = vsel %vm141_vm0, %v1286_v14, %v1243_v45 }
 0x521   :  { %v1479_v42 = vpop.f32.mrf.mxu2 }
 0x525   :  { %1445 = vmatmul.bf16.gmra.mxu1 %v1306_v47 }
 0x529   :  { %v1480_v19 = vpop.f32.mrf.mxu2 }
 0x531   :  { %v1482_v48 = vpop.f32.mrf.mxu2 }
 0x539   :  { %v1483_v50 = vpop.f32.mrf.mxu2 }
 0x542   :  { %v1422_v54 = vpop.f32.mrf.mxu1 }
 0x543   :  { %v1423_v56 = vadd.f32 %v1882_v51, %v1422_v54 }
 0x545   :  { %v1459_v57 = vadd.f32 %v1458_v10, %v1423_v56 }
 0x547   :  { %v1485_v60 = vmax.f32 %v1459_v57, 0.0 }
 0x549   :  { %v1492_v61 = vsel %vm1491_vm9, %v1485_v60, -inf }
 0x54a   :  { %v1424_v35 = vpop.f32.mrf.mxu1  ;;  %1493 = vmax.xlane.f32.xlu2 %v1492_v61 }
 0x54b   :  { %v1425_v44 = vadd.f32 %v1882_v51, %v1424_v35 }
 0x54d   :  { %v1461_v49 = vadd.f32 %v1460_v16, %v1425_v44 }
 0x54f   :  { %v1486_v63 = vmax.f32 %v1461_v49, 0.0 }
 0x551   :  { %v1495_v0 = vsel %vm1491_vm9, %v1486_v63, -inf }
 0x552   :  { %v1427_v1 = vpop.f32.mrf.mxu1  ;;  %1496 = vmax.xlane.f32.xlu0 %v1495_v0  ;;  %v1883_v0 = vld [vmem:[%s2491_s10] ss:$0 sm:$0xff] }
 0x553   :  { %v1428_v18 = vadd.f32 %v1882_v51, %v1427_v1 }
 0x555   :  { %v1464_v52 = vadd.f32 %v2430_v22, %v1428_v18  ;;  %v1511_v22 = vld [vmem:[%s2490_s9 + $0x8] sm:$0xff] }
 0x557   :  { %v1487_v12 = vmax.f32 %v1464_v52, 0.0 }
 0x559   :  { %v1498_v40 = vsel %vm1491_vm9, %v1487_v12, -inf }
 0x55a   :  { %v1429_v2 = vpop.f32.mrf.mxu1 }
 0x562   :  { %v1431_v39 = vpop.f32.mrf.mxu1 }
 0x56a   :  { %v1432_v3 = vpop.f32.mrf.mxu1 }
 0x572   :  { %v1434_v9 = vpop.f32.mrf.mxu1 }
 0x57a   :  { %v1435_v55 = vpop.f32.mrf.mxu1 }
 0x57b   :  { %v1436_v11 = vadd.f32 %v1882_v51, %v1435_v55 }
 0x57d   :  { %v1472_v10 = vadd.f32 %v1471_v30, %v1436_v11 }
 0x57f   :  { %v1488_v13 = vmax.f32 %v1472_v10, 0.0 }
 0x581   :  { %v1501_v15 = vsel %vm1491_vm9, %v1488_v13, -inf }
 0x582   :  { %v1438_v43 = vpop.f32.mrf.mxu1  ;;  %1502 = vmax.xlane.f32.xlu1 %v1501_v15 }
 0x583   :  { %v1439_v17 = vadd.f32 %v1882_v51, %v1438_v43 }
 0x585   :  { %v1475_v16 = vadd.f32 %v1474_v31, %v1439_v17 }
 0x587   :  { %v1489_v37 = vmax.f32 %v1475_v16, 0.0 }
 0x589   :  { %v1504_v6 = vsel %vm1491_vm9, %v1489_v37, -inf }
 0x58a   :  { %v1440_v53 = vpop.f32.mrf.mxu1  ;;  %1505 = vmax.xlane.f32.xlu2 %v1504_v6 }
 0x58b   :  { %v1441_v20 = vadd.f32 %v1882_v51, %v1440_v53 }
 0x58d   :  { %v1477_v21 = vadd.f32 %v1476_v58, %v1441_v20 }
 0x58f   :  { %v1490_v59 = vmax.f32 %v1477_v21, 0.0 }
 0x591   :  { %v1507_v24 = vsel %vm1491_vm9, %v1490_v59, -inf }
 0x592   :  { %1508 = vmax.xlane.f32.xlu0 %v1507_v24  ;;  %1499 = vmax.xlane.f32.xlu2 %v1498_v40  ;;  %v1443_v25 = vpop.f32.mrf.mxu1 }
 0x59a   :  { %v1444_v5 = vpop.f32.mrf.mxu1 }
 0x5a2   :  { %v1446_v23 = vpop.f32.mrf.mxu1 }
 0x5aa   :  { %v1447_v8 = vpop.f32.mrf.mxu1 }
 0x5bd   :  { %v1494_v26 = vpop.xlane.xlu2 %1493 }
 0x5be   :  { %v1513_v29 = vmul.f32 %v1510_v62, %v1494_v26 }
 0x5c0   :  { %v1516_v38 = vsel %vm647_vm6, %v1513_v29, 0.0 }
 0x5c5   :  { %v1497_v7 = vpop.xlane.xlu0 %1496 }
 0x5c6   :  { %v1514_v30 = vmul.f32 %v1511_v22, %v1497_v7 }
 0x5c8   :  { %v1517_v33 = vsel %vm647_vm6, %v1514_v30, 0.0 }
 0x5c9   :  { %v1518_v46 = vadd.f32 %v1517_v33, %v1516_v38 }
 0x5f5   :  { %v1503_v27 = vpop.xlane.xlu1 %1502 }
 0x5f6   :  { %v1528_v31 = vmul.f32 %v1510_v62, %v1503_v27 }
 0x5f8   :  { %v1531_v41 = vsel %vm647_vm6, %v1528_v31, 0.0 }
 0x5fd   :  { %v1506_v4 = vpop.xlane.xlu2 %1505 }
 0x5fe   :  { %v1529_v28 = vmul.f32 %v1511_v22, %v1506_v4 }
 0x600   :  { %v1532_v34 = vsel %vm647_vm6, %v1529_v28, 0.0 }
 0x601   :  { %v1533_v14 = vadd.f32 %v1532_v34, %v1531_v41 }
 0x605   :  { %v1509_v36 = vpop.xlane.xlu0 %1508  ;;  %v1500_v58 = vpop.xlane.xlu2 %1499 }
 0x606   :  { %v1530_v42 = vmul.f32 %v1512_v32, %v1509_v36  ;;  %v1515_v45 = vmul.f32 %v1512_v32, %v1500_v58 }
 0x608   :  { %v1534_v47 = vsel %vm1519_vm10, %v1530_v42, 0.0  ;;  %v1520_v19 = vsel %vm1519_vm10, %v1515_v45, 0.0 }
 0x609   :  { %v1535_v48 = vadd.f32 %v1534_v47, %v1533_v14  ;;  %v1521_v50 = vadd.f32 %v1520_v19, %v1518_v46 }
 0x60b   :  { %v1536_v51 = vrot.slane %v1535_v48, 4  ;;  %v1522_v54 = vrot.slane %v1521_v50, 4 }
 0x60d   :  { %v1537_v56 = vadd.f32 %v1536_v51, %v1535_v48  ;;  %v1523_v57 = vadd.f32 %v1522_v54, %v1521_v50 }
 0x60f   :  { %v1538_v60 = vrot.slane %v1537_v56, 2  ;;  %v1524_v61 = vrot.slane %v1523_v57, 2 }
 0x611   :  { %v1539_v35 = vadd.f32 %v1538_v60, %v1537_v56  ;;  %v1525_v44 = vadd.f32 %v1524_v61, %v1523_v57 }
 0x613   :  { %v1540_v49 = vrot.slane %v1539_v35, 1  ;;  %v1526_v63 = vrot.slane %v1525_v44, 1 }
 0x615   :  { %v1541_v1 = vadd.f32 %v1540_v49, %v1539_v35  ;;  %v1527_v2 = vadd.f32 %v1526_v63, %v1525_v44 }
 0x617   :  { %v1543_v39 = vsel %vm1542_vm11, %v1527_v2, %v1541_v1 }
 0x618   :  { %v1548_v3 = vadd.f32 %v1883_v0, %v1543_v39 }
 0x61a   :  { %1550 = vst.msk [vmem:[#allocation2] sm:$0x3] %vm1549_vm12, %v1548_v3 }
 0x61b   :  { %1561 = dma.vmem_to_hbm [thread:$0]  %s1557_s2, 32, %s1559_s0, [#allocation3]  }
 0x61c   :  { %1908 = dma.done.wait [#allocation3], 32  }
 0x61d   :  { %1909 = vsyncadd [#allocation3], 4294967264 }
 0x61e   :  { %1566 = vsyncpa [#allocation3], 1 }

</bundles_post_ra>
